<compile_context>
chip_gen: v7x
topology: tpu7x:2x2x1
jax: 0.10.0
libtpu: 0.0.40
codegen_flags: <defaults>
</compile_context>

<pallas_src>
import jax
import jax.numpy as jnp
from jax.experimental import pallas as pl
from jax.experimental.pallas import tpu as pltpu

N_NODES = 21          # fixed by fc1 in-features: 441 = 21 * 21
GCN_DIM = 21
FC_DIM = 512
_N_ACC = 4            # independent fc1 partial accumulators


def _round_up(x, m):
    return ((x + m - 1) // m) * m


def graph_net_kernel(x0_ref, a_norm_ref,
                     wg1_ref, bg1_ref, wg2_ref, bg2_ref,
                     wf1_ref, bf1_ref, wf2_ref, bf2_ref, wf3_ref, bf3_ref,
                     out_ref):
    f32 = jnp.float32
    bf16 = jnp.bfloat16

    a_norm = a_norm_ref[...]                      # [N, N] f32 (precomputed)
    x0 = x0_ref[...]                              # [N, F] f32 (batch 0 only)

    # GCN layer 1: A_norm @ (X W) + b   (no activation, as in the module)
    h1 = jnp.dot(a_norm,
                 jnp.dot(x0, wg1_ref[...], preferred_element_type=f32),
                 preferred_element_type=f32) + bg1_ref[...]          # [N, 21]
    # GCN layer 2
    h2 = jnp.dot(a_norm,
                 jnp.dot(h1, wg2_ref[...], preferred_element_type=f32),
                 preferred_element_type=f32) + bg2_ref[...]          # [N, 21]

    h2b = h2.astype(bf16)                         # cast once for MXU bf16 path

    # fc1 over the row-major flatten of h2, expressed as 21 node-indexed
    # (1,21)@(21,512) bf16 matmuls.  wf1 is (21, 21, 512): wf1_ref[n] is an
    # aligned leading-dim slab (no sublane-unaligned slicing on the weight).
    # _N_ACC independent partial sums break the serial VALU add chain.
    accs = [jnp.zeros((1, FC_DIM), f32) for _ in range(_N_ACC)]
    for n in range(N_NODES):                      # static, unrolled
        p = jnp.dot(h2b[n:n + 1, :], wf1_ref[n], preferred_element_type=f32)
        accs[n % _N_ACC] = accs[n % _N_ACC] + p
    z1 = accs[0] + accs[1] + accs[2] + accs[3] + bf1_ref[...]        # [1, 512]
    z1 = jnp.maximum(z1, 0.0)

    z2 = jnp.maximum(
        jnp.dot(z1.astype(bf16), wf2_ref[...],
                preferred_element_type=f32) + bf2_ref[...], 0.0)     # [1, 512]
    z3 = jnp.maximum(
        jnp.dot(z2.astype(bf16), wf3_ref[...],
                preferred_element_type=f32) + bf3_ref[...], 0.0)     # [1, OUT_PAD]

    out_ref[...] = z3                             # lane-dense (1, OUT_PAD) store


def graph_generic_network(state, adj, kp, n_actions):
    """Single pallas_call; all operands resident in VMEM (tiny shapes)."""
    f32 = jnp.float32
    n = adj.shape[-1]

    # --- hoisted out of the kernel: normalization depends only on adj ---
    # adj is treated as symmetric (undirected graph); one degree vector on both
    # sides matches standard GCN D^-1/2 (A+I) D^-1/2 semantics.
    a_hat = adj.astype(f32) + jnp.eye(n, dtype=f32)
    d = jax.lax.rsqrt(jnp.sum(a_hat, axis=1))
    a_norm = d[:, None] * a_hat * d[None, :]

    # Only batch element 0 reaches the output -> slice before the DMA.
    x0 = state[0].astype(f32)

    out_pad = kp["wf3"].shape[1]
    vmem = pl.BlockSpec(memory_space=pltpu.MemorySpace.VMEM)
    args = (x0, a_norm,
            kp["wg1"], kp["bg1"], kp["wg2"], kp["bg2"],
            kp["wf1"], kp["bf1"], kp["wf2"], kp["bf2"], kp["wf3"], kp["bf3"])
    out = pl.pallas_call(
        graph_net_kernel,
        out_shape=jax.ShapeDtypeStruct((1, out_pad), f32),
        in_specs=[vmem] * len(args),
        out_specs=vmem,
    )(*args)
    return out[0, :n_actions]                      # [n_actions]


def init_params(key, node_feature, n_actions):
    """PyTorch-equivalent f32 parameters, stored pre-transposed as [in, out]."""
    ks = jax.random.split(key, 10)
    s = 0.1
    return {
        "wg1": s * jax.random.normal(ks[0], (node_feature, GCN_DIM), jnp.float32),
        "bg1": s * jax.random.normal(ks[1], (1, GCN_DIM), jnp.float32),
        "wg2": s * jax.random.normal(ks[2], (GCN_DIM, GCN_DIM), jnp.float32),
        "bg2": s * jax.random.normal(ks[3], (1, GCN_DIM), jnp.float32),
        "wf1": s * jax.random.normal(ks[4], (N_NODES * GCN_DIM, FC_DIM), jnp.float32),
        "bf1": s * jax.random.normal(ks[5], (1, FC_DIM), jnp.float32),
        "wf2": s * jax.random.normal(ks[6], (FC_DIM, FC_DIM), jnp.float32),
        "bf2": s * jax.random.normal(ks[7], (1, FC_DIM), jnp.float32),
        "wf3": s * jax.random.normal(ks[8], (FC_DIM, n_actions), jnp.float32),
        "bf3": s * jax.random.normal(ks[9], (1, n_actions), jnp.float32),
    }


def prepare_params(params):
    """Kernel layout: fc weights in bf16, wf1 as (node, feat, out), wf3/bf3
    zero-padded to a lane-dense (multiple-of-128) output width."""
    bf16 = jnp.bfloat16
    n_actions = params["wf3"].shape[1]
    out_pad = _round_up(n_actions, 128)
    pad_cols = out_pad - n_actions
    return {
        "wg1": params["wg1"], "bg1": params["bg1"],
        "wg2": params["wg2"], "bg2": params["bg2"],
        "wf1": params["wf1"].reshape(N_NODES, GCN_DIM, FC_DIM).astype(bf16),
        "bf1": params["bf1"],
        "wf2": params["wf2"].astype(bf16),
        "bf2": params["bf2"],
        "wf3": jnp.pad(params["wf3"].astype(bf16), ((0, 0), (0, pad_cols))),
        "bf3": jnp.pad(params["bf3"], ((0, 0), (0, pad_cols))),
    }


def reference_forward(state, adj, kp, n_actions):
    """Pure-JAX reference of the same forward (bf16 weights / f32 accumulate),
    mirroring the kernel's numerics for the correctness check."""
    f32, bf16 = jnp.float32, jnp.bfloat16
    n = adj.shape[-1]
    a_hat = adj.astype(f32) + jnp.eye(n, dtype=f32)
    d = jax.lax.rsqrt(jnp.sum(a_hat, axis=1))
    a_norm = d[:, None] * a_hat * d[None, :]
    x0 = state[0].astype(f32)
    h1 = a_norm @ (x0 @ kp["wg1"]) + kp["bg1"]
    h2 = a_norm @ (h1 @ kp["wg2"]) + kp["bg2"]
    v = h2.astype(bf16).reshape(1, -1)                               # [1, 441]
    wf1_flat = kp["wf1"].reshape(N_NODES * GCN_DIM, FC_DIM)
    z1 = jnp.maximum(
        jnp.dot(v, wf1_flat, preferred_element_type=f32) + kp["bf1"], 0.0)
    z2 = jnp.maximum(
        jnp.dot(z1.astype(bf16), kp["wf2"], preferred_element_type=f32)
        + kp["bf2"], 0.0)
    z3 = jnp.maximum(
        jnp.dot(z2.astype(bf16), kp["wf3"], preferred_element_type=f32)
        + kp["bf3"], 0.0)
    return z3[0, :n_actions]


if __name__ == "__main__":
    key = jax.random.PRNGKey(0)
    k_state, k_adj, k_params = jax.random.split(key, 3)

    B, node_feature, n_actions = 2, 5, 4
    state = jax.random.normal(k_state, (B, N_NODES, node_feature), jnp.float32)

    # random symmetric 0/1 adjacency (undirected graph), zero diagonal
    r = jax.random.bernoulli(k_adj, 0.3, (N_NODES, N_NODES))
    adj = jnp.triu(r.astype(jnp.float32), 1)
    adj = adj + adj.T

    params = init_params(k_params, node_feature, n_actions)
    kparams = prepare_params(params)

    fwd = jax.jit(graph_generic_network, static_argnums=3)
    out = jax.block_until_ready(fwd(state, adj, kparams, n_actions))

    ref = reference_forward(state, adj, kparams, n_actions)
    assert out.shape == (n_actions,)
    assert jnp.allclose(out, ref, atol=1e-3, rtol=1e-3), (out, ref)

    print("KERNEL_OK")
</pallas_src>

<mosaic_0001>
module attributes {stable_mosaic.version = 11 : i64} {
  func.func @graph_net_kernel(%arg0: memref<21x5xf32, #tpu.memory_space<vmem>>, %arg1: memref<21x21xf32, #tpu.memory_space<vmem>>, %arg2: memref<5x21xf32, #tpu.memory_space<vmem>>, %arg3: memref<1x21xf32, #tpu.memory_space<vmem>>, %arg4: memref<21x21xf32, #tpu.memory_space<vmem>>, %arg5: memref<1x21xf32, #tpu.memory_space<vmem>>, %arg6: memref<21x21x512xbf16, #tpu.memory_space<vmem>>, %arg7: memref<1x512xf32, #tpu.memory_space<vmem>>, %arg8: memref<512x512xbf16, #tpu.memory_space<vmem>>, %arg9: memref<1x512xf32, #tpu.memory_space<vmem>>, %arg10: memref<512x128xbf16, #tpu.memory_space<vmem>>, %arg11: memref<1x128xf32, #tpu.memory_space<vmem>>, %arg12: memref<1x128xf32, #tpu.memory_space<vmem>>) attributes {dimension_semantics = [], scalar_prefetch = 0 : i64, scratch_operands = 0 : i64, tpu.core_type = #tpu.core_type<tc>} {
    %c0 = arith.constant 0 : index
    %c0_0 = arith.constant 0 : index
    %0 = vector.load %arg1[%c0, %c0_0] : memref<21x21xf32, #tpu.memory_space<vmem>>, vector<21x21xf32>
    %c0_1 = arith.constant 0 : index
    %c0_2 = arith.constant 0 : index
    %1 = vector.load %arg0[%c0_1, %c0_2] : memref<21x5xf32, #tpu.memory_space<vmem>>, vector<21x5xf32>
    %c0_3 = arith.constant 0 : index
    %c0_4 = arith.constant 0 : index
    %2 = vector.load %arg2[%c0_3, %c0_4] : memref<5x21xf32, #tpu.memory_space<vmem>>, vector<5x21xf32>
    %cst = arith.constant dense<0.000000e+00> : vector<21x21xf32>
    %3 = tpu.matmul %1, %2, %cst {dimension_numbers = #tpu.dot_dimension_numbers<[1], [0], [0], [1], [0, 0, 1, 1], [], []>} : vector<21x5xf32>, vector<5x21xf32>, vector<21x21xf32> -> vector<21x21xf32>
    %cst_5 = arith.constant dense<0.000000e+00> : vector<21x21xf32>
    %4 = tpu.matmul %0, %3, %cst_5 {dimension_numbers = #tpu.dot_dimension_numbers<[1], [0], [0], [1], [0, 0, 1, 1], [], []>} : vector<21x21xf32>, vector<21x21xf32>, vector<21x21xf32> -> vector<21x21xf32>
    %c0_6 = arith.constant 0 : index
    %c0_7 = arith.constant 0 : index
    %5 = vector.load %arg3[%c0_6, %c0_7] : memref<1x21xf32, #tpu.memory_space<vmem>>, vector<1x21xf32>
    %6 = vector.broadcast %5 : vector<1x21xf32> to vector<21x21xf32>
    %7 = arith.addf %4, %6 : vector<21x21xf32>
    %c0_8 = arith.constant 0 : index
    %c0_9 = arith.constant 0 : index
    %8 = vector.load %arg4[%c0_8, %c0_9] : memref<21x21xf32, #tpu.memory_space<vmem>>, vector<21x21xf32>
    %cst_10 = arith.constant dense<0.000000e+00> : vector<21x21xf32>
    %9 = tpu.matmul %7, %8, %cst_10 {dimension_numbers = #tpu.dot_dimension_numbers<[1], [0], [0], [1], [0, 0, 1, 1], [], []>} : vector<21x21xf32>, vector<21x21xf32>, vector<21x21xf32> -> vector<21x21xf32>
    %cst_11 = arith.constant dense<0.000000e+00> : vector<21x21xf32>
    %10 = tpu.matmul %0, %9, %cst_11 {dimension_numbers = #tpu.dot_dimension_numbers<[1], [0], [0], [1], [0, 0, 1, 1], [], []>} : vector<21x21xf32>, vector<21x21xf32>, vector<21x21xf32> -> vector<21x21xf32>
    %c0_12 = arith.constant 0 : index
    %c0_13 = arith.constant 0 : index
    %11 = vector.load %arg5[%c0_12, %c0_13] : memref<1x21xf32, #tpu.memory_space<vmem>>, vector<1x21xf32>
    %12 = vector.broadcast %11 : vector<1x21xf32> to vector<21x21xf32>
    %13 = arith.addf %10, %12 : vector<21x21xf32>
    %14 = arith.truncf %13 : vector<21x21xf32> to vector<21x21xbf16>
    %cst_14 = arith.constant 0.000000e+00 : f32
    %15 = vector.broadcast %cst_14 : f32 to vector<1x512xf32>
    %cst_15 = arith.constant 0.000000e+00 : f32
    %16 = vector.broadcast %cst_15 : f32 to vector<1x512xf32>
    %cst_16 = arith.constant 0.000000e+00 : f32
    %17 = vector.broadcast %cst_16 : f32 to vector<1x512xf32>
    %cst_17 = arith.constant 0.000000e+00 : f32
    %18 = vector.broadcast %cst_17 : f32 to vector<1x512xf32>
    %19 = vector.extract_strided_slice %14 {offsets = [0, 0], sizes = [1, 21], strides = [1, 1]} : vector<21x21xbf16> to vector<1x21xbf16>
    %c0_18 = arith.constant 0 : index
    %c0_19 = arith.constant 0 : index
    %c0_20 = arith.constant 0 : index
    %20 = vector.load %arg6[%c0_18, %c0_19, %c0_20] : memref<21x21x512xbf16, #tpu.memory_space<vmem>>, vector<1x21x512xbf16>
    %21 = vector.shape_cast %20 : vector<1x21x512xbf16> to vector<21x512xbf16>
    %cst_21 = arith.constant dense<0.000000e+00> : vector<1x512xf32>
    %22 = tpu.matmul %19, %21, %cst_21 {dimension_numbers = #tpu.dot_dimension_numbers<[1], [0], [0], [1], [0, 0, 1, 1], [], []>} : vector<1x21xbf16>, vector<21x512xbf16>, vector<1x512xf32> -> vector<1x512xf32>
    %23 = arith.addf %15, %22 : vector<1x512xf32>
    %24 = vector.extract_strided_slice %14 {offsets = [1, 0], sizes = [1, 21], strides = [1, 1]} : vector<21x21xbf16> to vector<1x21xbf16>
    %c1 = arith.constant 1 : index
    %c0_22 = arith.constant 0 : index
    %c0_23 = arith.constant 0 : index
    %25 = vector.load %arg6[%c1, %c0_22, %c0_23] : memref<21x21x512xbf16, #tpu.memory_space<vmem>>, vector<1x21x512xbf16>
    %26 = vector.shape_cast %25 : vector<1x21x512xbf16> to vector<21x512xbf16>
    %cst_24 = arith.constant dense<0.000000e+00> : vector<1x512xf32>
    %27 = tpu.matmul %24, %26, %cst_24 {dimension_numbers = #tpu.dot_dimension_numbers<[1], [0], [0], [1], [0, 0, 1, 1], [], []>} : vector<1x21xbf16>, vector<21x512xbf16>, vector<1x512xf32> -> vector<1x512xf32>
    %28 = arith.addf %16, %27 : vector<1x512xf32>
    %29 = vector.extract_strided_slice %14 {offsets = [2, 0], sizes = [1, 21], strides = [1, 1]} : vector<21x21xbf16> to vector<1x21xbf16>
    %c2 = arith.constant 2 : index
    %c0_25 = arith.constant 0 : index
    %c0_26 = arith.constant 0 : index
    %30 = vector.load %arg6[%c2, %c0_25, %c0_26] : memref<21x21x512xbf16, #tpu.memory_space<vmem>>, vector<1x21x512xbf16>
    %31 = vector.shape_cast %30 : vector<1x21x512xbf16> to vector<21x512xbf16>
    %cst_27 = arith.constant dense<0.000000e+00> : vector<1x512xf32>
    %32 = tpu.matmul %29, %31, %cst_27 {dimension_numbers = #tpu.dot_dimension_numbers<[1], [0], [0], [1], [0, 0, 1, 1], [], []>} : vector<1x21xbf16>, vector<21x512xbf16>, vector<1x512xf32> -> vector<1x512xf32>
    %33 = arith.addf %17, %32 : vector<1x512xf32>
    %34 = vector.extract_strided_slice %14 {offsets = [3, 0], sizes = [1, 21], strides = [1, 1]} : vector<21x21xbf16> to vector<1x21xbf16>
    %c3 = arith.constant 3 : index
    %c0_28 = arith.constant 0 : index
    %c0_29 = arith.constant 0 : index
    %35 = vector.load %arg6[%c3, %c0_28, %c0_29] : memref<21x21x512xbf16, #tpu.memory_space<vmem>>, vector<1x21x512xbf16>
    %36 = vector.shape_cast %35 : vector<1x21x512xbf16> to vector<21x512xbf16>
    %cst_30 = arith.constant dense<0.000000e+00> : vector<1x512xf32>
    %37 = tpu.matmul %34, %36, %cst_30 {dimension_numbers = #tpu.dot_dimension_numbers<[1], [0], [0], [1], [0, 0, 1, 1], [], []>} : vector<1x21xbf16>, vector<21x512xbf16>, vector<1x512xf32> -> vector<1x512xf32>
    %38 = arith.addf %18, %37 : vector<1x512xf32>
    %39 = vector.extract_strided_slice %14 {offsets = [4, 0], sizes = [1, 21], strides = [1, 1]} : vector<21x21xbf16> to vector<1x21xbf16>
    %c4 = arith.constant 4 : index
    %c0_31 = arith.constant 0 : index
    %c0_32 = arith.constant 0 : index
    %40 = vector.load %arg6[%c4, %c0_31, %c0_32] : memref<21x21x512xbf16, #tpu.memory_space<vmem>>, vector<1x21x512xbf16>
    %41 = vector.shape_cast %40 : vector<1x21x512xbf16> to vector<21x512xbf16>
    %cst_33 = arith.constant dense<0.000000e+00> : vector<1x512xf32>
    %42 = tpu.matmul %39, %41, %cst_33 {dimension_numbers = #tpu.dot_dimension_numbers<[1], [0], [0], [1], [0, 0, 1, 1], [], []>} : vector<1x21xbf16>, vector<21x512xbf16>, vector<1x512xf32> -> vector<1x512xf32>
    %43 = arith.addf %23, %42 : vector<1x512xf32>
    %44 = vector.extract_strided_slice %14 {offsets = [5, 0], sizes = [1, 21], strides = [1, 1]} : vector<21x21xbf16> to vector<1x21xbf16>
    %c5 = arith.constant 5 : index
    %c0_34 = arith.constant 0 : index
    %c0_35 = arith.constant 0 : index
    %45 = vector.load %arg6[%c5, %c0_34, %c0_35] : memref<21x21x512xbf16, #tpu.memory_space<vmem>>, vector<1x21x512xbf16>
    %46 = vector.shape_cast %45 : vector<1x21x512xbf16> to vector<21x512xbf16>
    %cst_36 = arith.constant dense<0.000000e+00> : vector<1x512xf32>
    %47 = tpu.matmul %44, %46, %cst_36 {dimension_numbers = #tpu.dot_dimension_numbers<[1], [0], [0], [1], [0, 0, 1, 1], [], []>} : vector<1x21xbf16>, vector<21x512xbf16>, vector<1x512xf32> -> vector<1x512xf32>
    %48 = arith.addf %28, %47 : vector<1x512xf32>
    %49 = vector.extract_strided_slice %14 {offsets = [6, 0], sizes = [1, 21], strides = [1, 1]} : vector<21x21xbf16> to vector<1x21xbf16>
    %c6 = arith.constant 6 : index
    %c0_37 = arith.constant 0 : index
    %c0_38 = arith.constant 0 : index
    %50 = vector.load %arg6[%c6, %c0_37, %c0_38] : memref<21x21x512xbf16, #tpu.memory_space<vmem>>, vector<1x21x512xbf16>
    %51 = vector.shape_cast %50 : vector<1x21x512xbf16> to vector<21x512xbf16>
    %cst_39 = arith.constant dense<0.000000e+00> : vector<1x512xf32>
    %52 = tpu.matmul %49, %51, %cst_39 {dimension_numbers = #tpu.dot_dimension_numbers<[1], [0], [0], [1], [0, 0, 1, 1], [], []>} : vector<1x21xbf16>, vector<21x512xbf16>, vector<1x512xf32> -> vector<1x512xf32>
    %53 = arith.addf %33, %52 : vector<1x512xf32>
    %54 = vector.extract_strided_slice %14 {offsets = [7, 0], sizes = [1, 21], strides = [1, 1]} : vector<21x21xbf16> to vector<1x21xbf16>
    %c7 = arith.constant 7 : index
    %c0_40 = arith.constant 0 : index
    %c0_41 = arith.constant 0 : index
    %55 = vector.load %arg6[%c7, %c0_40, %c0_41] : memref<21x21x512xbf16, #tpu.memory_space<vmem>>, vector<1x21x512xbf16>
    %56 = vector.shape_cast %55 : vector<1x21x512xbf16> to vector<21x512xbf16>
    %cst_42 = arith.constant dense<0.000000e+00> : vector<1x512xf32>
    %57 = tpu.matmul %54, %56, %cst_42 {dimension_numbers = #tpu.dot_dimension_numbers<[1], [0], [0], [1], [0, 0, 1, 1], [], []>} : vector<1x21xbf16>, vector<21x512xbf16>, vector<1x512xf32> -> vector<1x512xf32>
    %58 = arith.addf %38, %57 : vector<1x512xf32>
    %59 = vector.extract_strided_slice %14 {offsets = [8, 0], sizes = [1, 21], strides = [1, 1]} : vector<21x21xbf16> to vector<1x21xbf16>
    %c8 = arith.constant 8 : index
    %c0_43 = arith.constant 0 : index
    %c0_44 = arith.constant 0 : index
    %60 = vector.load %arg6[%c8, %c0_43, %c0_44] : memref<21x21x512xbf16, #tpu.memory_space<vmem>>, vector<1x21x512xbf16>
    %61 = vector.shape_cast %60 : vector<1x21x512xbf16> to vector<21x512xbf16>
    %cst_45 = arith.constant dense<0.000000e+00> : vector<1x512xf32>
    %62 = tpu.matmul %59, %61, %cst_45 {dimension_numbers = #tpu.dot_dimension_numbers<[1], [0], [0], [1], [0, 0, 1, 1], [], []>} : vector<1x21xbf16>, vector<21x512xbf16>, vector<1x512xf32> -> vector<1x512xf32>
    %63 = arith.addf %43, %62 : vector<1x512xf32>
    %64 = vector.extract_strided_slice %14 {offsets = [9, 0], sizes = [1, 21], strides = [1, 1]} : vector<21x21xbf16> to vector<1x21xbf16>
    %c9 = arith.constant 9 : index
    %c0_46 = arith.constant 0 : index
    %c0_47 = arith.constant 0 : index
    %65 = vector.load %arg6[%c9, %c0_46, %c0_47] : memref<21x21x512xbf16, #tpu.memory_space<vmem>>, vector<1x21x512xbf16>
    %66 = vector.shape_cast %65 : vector<1x21x512xbf16> to vector<21x512xbf16>
    %cst_48 = arith.constant dense<0.000000e+00> : vector<1x512xf32>
    %67 = tpu.matmul %64, %66, %cst_48 {dimension_numbers = #tpu.dot_dimension_numbers<[1], [0], [0], [1], [0, 0, 1, 1], [], []>} : vector<1x21xbf16>, vector<21x512xbf16>, vector<1x512xf32> -> vector<1x512xf32>
    %68 = arith.addf %48, %67 : vector<1x512xf32>
    %69 = vector.extract_strided_slice %14 {offsets = [10, 0], sizes = [1, 21], strides = [1, 1]} : vector<21x21xbf16> to vector<1x21xbf16>
    %c10 = arith.constant 10 : index
    %c0_49 = arith.constant 0 : index
    %c0_50 = arith.constant 0 : index
    %70 = vector.load %arg6[%c10, %c0_49, %c0_50] : memref<21x21x512xbf16, #tpu.memory_space<vmem>>, vector<1x21x512xbf16>
    %71 = vector.shape_cast %70 : vector<1x21x512xbf16> to vector<21x512xbf16>
    %cst_51 = arith.constant dense<0.000000e+00> : vector<1x512xf32>
    %72 = tpu.matmul %69, %71, %cst_51 {dimension_numbers = #tpu.dot_dimension_numbers<[1], [0], [0], [1], [0, 0, 1, 1], [], []>} : vector<1x21xbf16>, vector<21x512xbf16>, vector<1x512xf32> -> vector<1x512xf32>
    %73 = arith.addf %53, %72 : vector<1x512xf32>
    %74 = vector.extract_strided_slice %14 {offsets = [11, 0], sizes = [1, 21], strides = [1, 1]} : vector<21x21xbf16> to vector<1x21xbf16>
    %c11 = arith.constant 11 : index
    %c0_52 = arith.constant 0 : index
    %c0_53 = arith.constant 0 : index
    %75 = vector.load %arg6[%c11, %c0_52, %c0_53] : memref<21x21x512xbf16, #tpu.memory_space<vmem>>, vector<1x21x512xbf16>
    %76 = vector.shape_cast %75 : vector<1x21x512xbf16> to vector<21x512xbf16>
    %cst_54 = arith.constant dense<0.000000e+00> : vector<1x512xf32>
    %77 = tpu.matmul %74, %76, %cst_54 {dimension_numbers = #tpu.dot_dimension_numbers<[1], [0], [0], [1], [0, 0, 1, 1], [], []>} : vector<1x21xbf16>, vector<21x512xbf16>, vector<1x512xf32> -> vector<1x512xf32>
    %78 = arith.addf %58, %77 : vector<1x512xf32>
    %79 = vector.extract_strided_slice %14 {offsets = [12, 0], sizes = [1, 21], strides = [1, 1]} : vector<21x21xbf16> to vector<1x21xbf16>
    %c12 = arith.constant 12 : index
    %c0_55 = arith.constant 0 : index
    %c0_56 = arith.constant 0 : index
    %80 = vector.load %arg6[%c12, %c0_55, %c0_56] : memref<21x21x512xbf16, #tpu.memory_space<vmem>>, vector<1x21x512xbf16>
    %81 = vector.shape_cast %80 : vector<1x21x512xbf16> to vector<21x512xbf16>
    %cst_57 = arith.constant dense<0.000000e+00> : vector<1x512xf32>
    %82 = tpu.matmul %79, %81, %cst_57 {dimension_numbers = #tpu.dot_dimension_numbers<[1], [0], [0], [1], [0, 0, 1, 1], [], []>} : vector<1x21xbf16>, vector<21x512xbf16>, vector<1x512xf32> -> vector<1x512xf32>
    %83 = arith.addf %63, %82 : vector<1x512xf32>
    %84 = vector.extract_strided_slice %14 {offsets = [13, 0], sizes = [1, 21], strides = [1, 1]} : vector<21x21xbf16> to vector<1x21xbf16>
    %c13 = arith.constant 13 : index
    %c0_58 = arith.constant 0 : index
    %c0_59 = arith.constant 0 : index
    %85 = vector.load %arg6[%c13, %c0_58, %c0_59] : memref<21x21x512xbf16, #tpu.memory_space<vmem>>, vector<1x21x512xbf16>
    %86 = vector.shape_cast %85 : vector<1x21x512xbf16> to vector<21x512xbf16>
    %cst_60 = arith.constant dense<0.000000e+00> : vector<1x512xf32>
    %87 = tpu.matmul %84, %86, %cst_60 {dimension_numbers = #tpu.dot_dimension_numbers<[1], [0], [0], [1], [0, 0, 1, 1], [], []>} : vector<1x21xbf16>, vector<21x512xbf16>, vector<1x512xf32> -> vector<1x512xf32>
    %88 = arith.addf %68, %87 : vector<1x512xf32>
    %89 = vector.extract_strided_slice %14 {offsets = [14, 0], sizes = [1, 21], strides = [1, 1]} : vector<21x21xbf16> to vector<1x21xbf16>
    %c14 = arith.constant 14 : index
    %c0_61 = arith.constant 0 : index
    %c0_62 = arith.constant 0 : index
    %90 = vector.load %arg6[%c14, %c0_61, %c0_62] : memref<21x21x512xbf16, #tpu.memory_space<vmem>>, vector<1x21x512xbf16>
    %91 = vector.shape_cast %90 : vector<1x21x512xbf16> to vector<21x512xbf16>
    %cst_63 = arith.constant dense<0.000000e+00> : vector<1x512xf32>
    %92 = tpu.matmul %89, %91, %cst_63 {dimension_numbers = #tpu.dot_dimension_numbers<[1], [0], [0], [1], [0, 0, 1, 1], [], []>} : vector<1x21xbf16>, vector<21x512xbf16>, vector<1x512xf32> -> vector<1x512xf32>
    %93 = arith.addf %73, %92 : vector<1x512xf32>
    %94 = vector.extract_strided_slice %14 {offsets = [15, 0], sizes = [1, 21], strides = [1, 1]} : vector<21x21xbf16> to vector<1x21xbf16>
    %c15 = arith.constant 15 : index
    %c0_64 = arith.constant 0 : index
    %c0_65 = arith.constant 0 : index
    %95 = vector.load %arg6[%c15, %c0_64, %c0_65] : memref<21x21x512xbf16, #tpu.memory_space<vmem>>, vector<1x21x512xbf16>
    %96 = vector.shape_cast %95 : vector<1x21x512xbf16> to vector<21x512xbf16>
    %cst_66 = arith.constant dense<0.000000e+00> : vector<1x512xf32>
    %97 = tpu.matmul %94, %96, %cst_66 {dimension_numbers = #tpu.dot_dimension_numbers<[1], [0], [0], [1], [0, 0, 1, 1], [], []>} : vector<1x21xbf16>, vector<21x512xbf16>, vector<1x512xf32> -> vector<1x512xf32>
    %98 = arith.addf %78, %97 : vector<1x512xf32>
    %99 = vector.extract_strided_slice %14 {offsets = [16, 0], sizes = [1, 21], strides = [1, 1]} : vector<21x21xbf16> to vector<1x21xbf16>
    %c16 = arith.constant 16 : index
    %c0_67 = arith.constant 0 : index
    %c0_68 = arith.constant 0 : index
    %100 = vector.load %arg6[%c16, %c0_67, %c0_68] : memref<21x21x512xbf16, #tpu.memory_space<vmem>>, vector<1x21x512xbf16>
    %101 = vector.shape_cast %100 : vector<1x21x512xbf16> to vector<21x512xbf16>
    %cst_69 = arith.constant dense<0.000000e+00> : vector<1x512xf32>
    %102 = tpu.matmul %99, %101, %cst_69 {dimension_numbers = #tpu.dot_dimension_numbers<[1], [0], [0], [1], [0, 0, 1, 1], [], []>} : vector<1x21xbf16>, vector<21x512xbf16>, vector<1x512xf32> -> vector<1x512xf32>
    %103 = arith.addf %83, %102 : vector<1x512xf32>
    %104 = vector.extract_strided_slice %14 {offsets = [17, 0], sizes = [1, 21], strides = [1, 1]} : vector<21x21xbf16> to vector<1x21xbf16>
    %c17 = arith.constant 17 : index
    %c0_70 = arith.constant 0 : index
    %c0_71 = arith.constant 0 : index
    %105 = vector.load %arg6[%c17, %c0_70, %c0_71] : memref<21x21x512xbf16, #tpu.memory_space<vmem>>, vector<1x21x512xbf16>
    %106 = vector.shape_cast %105 : vector<1x21x512xbf16> to vector<21x512xbf16>
    %cst_72 = arith.constant dense<0.000000e+00> : vector<1x512xf32>
    %107 = tpu.matmul %104, %106, %cst_72 {dimension_numbers = #tpu.dot_dimension_numbers<[1], [0], [0], [1], [0, 0, 1, 1], [], []>} : vector<1x21xbf16>, vector<21x512xbf16>, vector<1x512xf32> -> vector<1x512xf32>
    %108 = arith.addf %88, %107 : vector<1x512xf32>
    %109 = vector.extract_strided_slice %14 {offsets = [18, 0], sizes = [1, 21], strides = [1, 1]} : vector<21x21xbf16> to vector<1x21xbf16>
    %c18 = arith.constant 18 : index
    %c0_73 = arith.constant 0 : index
    %c0_74 = arith.constant 0 : index
    %110 = vector.load %arg6[%c18, %c0_73, %c0_74] : memref<21x21x512xbf16, #tpu.memory_space<vmem>>, vector<1x21x512xbf16>
    %111 = vector.shape_cast %110 : vector<1x21x512xbf16> to vector<21x512xbf16>
    %cst_75 = arith.constant dense<0.000000e+00> : vector<1x512xf32>
    %112 = tpu.matmul %109, %111, %cst_75 {dimension_numbers = #tpu.dot_dimension_numbers<[1], [0], [0], [1], [0, 0, 1, 1], [], []>} : vector<1x21xbf16>, vector<21x512xbf16>, vector<1x512xf32> -> vector<1x512xf32>
    %113 = arith.addf %93, %112 : vector<1x512xf32>
    %114 = vector.extract_strided_slice %14 {offsets = [19, 0], sizes = [1, 21], strides = [1, 1]} : vector<21x21xbf16> to vector<1x21xbf16>
    %c19 = arith.constant 19 : index
    %c0_76 = arith.constant 0 : index
    %c0_77 = arith.constant 0 : index
    %115 = vector.load %arg6[%c19, %c0_76, %c0_77] : memref<21x21x512xbf16, #tpu.memory_space<vmem>>, vector<1x21x512xbf16>
    %116 = vector.shape_cast %115 : vector<1x21x512xbf16> to vector<21x512xbf16>
    %cst_78 = arith.constant dense<0.000000e+00> : vector<1x512xf32>
    %117 = tpu.matmul %114, %116, %cst_78 {dimension_numbers = #tpu.dot_dimension_numbers<[1], [0], [0], [1], [0, 0, 1, 1], [], []>} : vector<1x21xbf16>, vector<21x512xbf16>, vector<1x512xf32> -> vector<1x512xf32>
    %118 = arith.addf %98, %117 : vector<1x512xf32>
    %119 = vector.extract_strided_slice %14 {offsets = [20, 0], sizes = [1, 21], strides = [1, 1]} : vector<21x21xbf16> to vector<1x21xbf16>
    %c20 = arith.constant 20 : index
    %c0_79 = arith.constant 0 : index
    %c0_80 = arith.constant 0 : index
    %120 = vector.load %arg6[%c20, %c0_79, %c0_80] : memref<21x21x512xbf16, #tpu.memory_space<vmem>>, vector<1x21x512xbf16>
    %121 = vector.shape_cast %120 : vector<1x21x512xbf16> to vector<21x512xbf16>
    %cst_81 = arith.constant dense<0.000000e+00> : vector<1x512xf32>
    %122 = tpu.matmul %119, %121, %cst_81 {dimension_numbers = #tpu.dot_dimension_numbers<[1], [0], [0], [1], [0, 0, 1, 1], [], []>} : vector<1x21xbf16>, vector<21x512xbf16>, vector<1x512xf32> -> vector<1x512xf32>
    %123 = arith.addf %103, %122 : vector<1x512xf32>
    %124 = arith.addf %123, %108 : vector<1x512xf32>
    %125 = arith.addf %124, %113 : vector<1x512xf32>
    %126 = arith.addf %125, %118 : vector<1x512xf32>
    %c0_82 = arith.constant 0 : index
    %c0_83 = arith.constant 0 : index
    %127 = vector.load %arg7[%c0_82, %c0_83] : memref<1x512xf32, #tpu.memory_space<vmem>>, vector<1x512xf32>
    %128 = arith.addf %126, %127 : vector<1x512xf32>
    %cst_84 = arith.constant 0.000000e+00 : f32
    %129 = vector.broadcast %cst_84 : f32 to vector<1x512xf32>
    %130 = arith.maximumf %128, %129 : vector<1x512xf32>
    %131 = arith.truncf %130 : vector<1x512xf32> to vector<1x512xbf16>
    %c0_85 = arith.constant 0 : index
    %c0_86 = arith.constant 0 : index
    %132 = vector.load %arg8[%c0_85, %c0_86] : memref<512x512xbf16, #tpu.memory_space<vmem>>, vector<512x512xbf16>
    %cst_87 = arith.constant dense<0.000000e+00> : vector<1x512xf32>
    %133 = tpu.matmul %131, %132, %cst_87 {dimension_numbers = #tpu.dot_dimension_numbers<[1], [0], [0], [1], [0, 0, 1, 1], [], []>} : vector<1x512xbf16>, vector<512x512xbf16>, vector<1x512xf32> -> vector<1x512xf32>
    %c0_88 = arith.constant 0 : index
    %c0_89 = arith.constant 0 : index
    %134 = vector.load %arg9[%c0_88, %c0_89] : memref<1x512xf32, #tpu.memory_space<vmem>>, vector<1x512xf32>
    %135 = arith.addf %133, %134 : vector<1x512xf32>
    %cst_90 = arith.constant 0.000000e+00 : f32
    %136 = vector.broadcast %cst_90 : f32 to vector<1x512xf32>
    %137 = arith.maximumf %135, %136 : vector<1x512xf32>
    %138 = arith.truncf %137 : vector<1x512xf32> to vector<1x512xbf16>
    %c0_91 = arith.constant 0 : index
    %c0_92 = arith.constant 0 : index
    %139 = vector.load %arg10[%c0_91, %c0_92] : memref<512x128xbf16, #tpu.memory_space<vmem>>, vector<512x128xbf16>
    %cst_93 = arith.constant dense<0.000000e+00> : vector<1x128xf32>
    %140 = tpu.matmul %138, %139, %cst_93 {dimension_numbers = #tpu.dot_dimension_numbers<[1], [0], [0], [1], [0, 0, 1, 1], [], []>} : vector<1x512xbf16>, vector<512x128xbf16>, vector<1x128xf32> -> vector<1x128xf32>
    %c0_94 = arith.constant 0 : index
    %c0_95 = arith.constant 0 : index
    %141 = vector.load %arg11[%c0_94, %c0_95] : memref<1x128xf32, #tpu.memory_space<vmem>>, vector<1x128xf32>
    %142 = arith.addf %140, %141 : vector<1x128xf32>
    %cst_96 = arith.constant 0.000000e+00 : f32
    %143 = vector.broadcast %cst_96 : f32 to vector<1x128xf32>
    %144 = arith.maximumf %142, %143 : vector<1x128xf32>
    %c0_97 = arith.constant 0 : index
    %c0_98 = arith.constant 0 : index
    %145 = vector.load %arg12[%c0_97, %c0_98] : memref<1x128xf32, #tpu.memory_space<vmem>>, vector<1x128xf32>
    tpu.vector_store %arg12[%c0_97, %c0_98], %144 {strides = array<i32>} : memref<1x128xf32, #tpu.memory_space<vmem>>, vector<1x128xf32>,
    return
  }
}

</mosaic_0001>

<bundles_post_ra>
// kernel: graph_generic_network.1
= control target key start
LH: loop header
LB: loop body
LE: loop exit
PB: predicated region body
PF: predicated region fallthrough
CT: control target
= control target key end

     0   :  { %17 = vsyncpa [#allocation3], 0  ;;  %s6237_s0 = inlined_call_operand.vmem [shape: f32[21,5], index: 0, kind: input, shape index: {}]   ;;  %s6238_s1 = inlined_call_operand.vmem [shape: f32[21,21], index: 1, kind: input, shape index: {}]   ;;  %s6239_s2 = inlined_call_operand.vmem [shape: f32[5,21], index: 2, kind: input, shape index: {}]   ;;  %s6240_s3 = inlined_call_operand.vmem [shape: f32[1,21], index: 3, kind: input, shape index: {}]   ;;  %s6241_s4 = inlined_call_operand.vmem [shape: f32[21,21], index: 4, kind: input, shape index: {}]   ;;  %s6242_s5 = inlined_call_operand.vmem [shape: f32[1,21], index: 5, kind: input, shape index: {}]   ;;  %s6243_s6 = inlined_call_operand.hbm [shape: bf16[21,21,512], index: 6, kind: input, shape index: {}]   ;;  %s6244_s7 = inlined_call_operand.vmem [shape: f32[1,512], index: 7, kind: input, shape index: {}]   ;;  %s6245_s8 = inlined_call_operand.hbm [shape: bf16[512,512], index: 8, kind: input, shape index: {}]   ;;  %s6246_s9 = inlined_call_operand.vmem [shape: f32[1,512], index: 9, kind: input, shape index: {}]   ;;  %s6247_s10 = inlined_call_operand.hbm [shape: bf16[512,128], index: 10, kind: input, shape index: {}]   ;;  %s6248_s11 = inlined_call_operand.vmem [shape: f32[1,128], index: 11, kind: input, shape index: {}]   ;;  %s6249_s12 = inlined_call_operand.vmem [shape: f32[1,128], index: 12, kind: output, shape index: {}]  }
   0x1   :  { %18 = vsyncpa [#allocation5], 0  ;;  %s5763_s21 = smov [#allocation4]   ;;  %s5764_s23 = smov [#allocation2]  }
   0x2   :  { %s50_s22 = sshll.u32 %s5763_s21, 4  ;;  %s36_s24 = sshll.u32 %s5764_s23, 4  ;;  %s51_s22 = int_to_ptr.vmem [resolvable:$true] %s50_s22  ;;  %s5840_s24 = int_to_ptr.vmem [resolvable:$true] %s36_s24 }
   0x3   :  { %s5693_s27 = scalar_lea.hbm %s6245_s8, 16384 }
   0x4   :  { %p5694_p0 = scmp.ne.s32.totalorder %s6245_s8, %s5693_s27  ;;  %p5697_p1 = scmp.lt.u32.totalorder %s5693_s27, %s6245_s8 }
   0x6   :  { %p5699_p2 = pnand %p5697_p1, %p5694_p0 }
   0x8   :  { %5702 = shalt.err (!%p5699_p2)
}
   0x9   :  { %s5703_s14 = scalar_lea.vmem %s51_s22, 16384  ;;  %p5708_p4 = scmp.lt.s32.totalorder %s51_s22, %s51_s22 }
   0xa   :  { %p5704_p3 = scmp.ne.s32.totalorder %s51_s22, %s5703_s14  ;;  %p5709_p5 = scmp.lt.s32.totalorder %s5703_s14, %s5703_s14 }
   0xc   :  { %p5710_p6 = por %p5709_p5, %p5708_p4 }
   0xe   :  { %p5711_p7 = pnand %p5710_p6, %p5704_p3 }
  0x10   :  { %5714 = shalt.err (!%p5711_p7)
}
  0x11   :  { %s5765_s15 = smov 256   ;;  %s5766_s16 = smov 16  }
  0x12   :  { %56 = dma.hbm_to_vmem [thread:$0]  %s6245_s8, 16384, %s51_s22, [#allocation5], %s5765_s15, %s5765_s15, %s5766_s16  }
  0x13   :  { %s5715_s21 = scalar_lea.hbm %s6243_s6, 16128 }
  0x14   :  { %p5716_p8 = scmp.ne.s32.totalorder %s6243_s6, %s5715_s21  ;;  %p5719_p9 = scmp.lt.u32.totalorder %s5715_s21, %s6243_s6 }
  0x16   :  { %p5721_p10 = pnand %p5719_p9, %p5716_p8 }
  0x18   :  { %5724 = shalt.err (!%p5721_p10)
}
  0x19   :  { %s5725_s28 = scalar_lea.vmem %s5840_s24, 16128  ;;  %p5730_p12 = scmp.lt.s32.totalorder %s5840_s24, %s5840_s24 }
  0x1a   :  { %p5726_p11 = scmp.ne.s32.totalorder %s5840_s24, %s5725_s28  ;;  %p5731_p13 = scmp.lt.s32.totalorder %s5725_s28, %s5725_s28 }
  0x1c   :  { %p5732_p0 = por %p5731_p13, %p5730_p12 }
  0x1e   :  { %p5733_p1 = pnand %p5732_p0, %p5726_p11 }
  0x20   :  { %5736 = shalt.err (!%p5733_p1)
}
  0x21   :  { %42 = dma.hbm_to_vmem [thread:$0]  %s6243_s6, 16128, %s5840_s24, [#allocation3], %s5765_s15, %s5765_s15, %s5766_s16  }
  0x22   :  { %s5767_s29 = smov [#allocation6]   ;;  %s5737_s17 = scalar_lea.hbm %s6247_s10, 4096 }
  0x23   :  { %s64_s30 = sshll.u32 %s5767_s29, 4  ;;  %p5738_p2 = scmp.ne.s32.totalorder %s6247_s10, %s5737_s17  ;;  %s65_s30 = int_to_ptr.vmem [resolvable:$true] %s64_s30 }
  0x24   :  { %p5741_p3 = scmp.lt.u32.totalorder %s5737_s17, %s6247_s10 }
  0x26   :  { %p5743_p4 = pnand %p5741_p3, %p5738_p2 }
  0x28   :  { %5746 = shalt.err (!%p5743_p4)
}
  0x29   :  { %s5747_s23 = scalar_lea.vmem %s65_s30, 4096  ;;  %p5752_p6 = scmp.lt.s32.totalorder %s65_s30, %s65_s30 }
  0x2a   :  { %p5748_p5 = scmp.ne.s32.totalorder %s65_s30, %s5747_s23  ;;  %p5753_p7 = scmp.lt.s32.totalorder %s5747_s23, %s5747_s23 }
  0x2c   :  { %p5754_p8 = por %p5753_p7, %p5752_p6 }
  0x2e   :  { %p5755_p9 = pnand %p5754_p8, %p5748_p5 }
  0x30   :  { %5758 = shalt.err (!%p5755_p9)
}
  0x31   :  { %s5768_s6 = smov 64   ;;  %s5769_s24 = smov 4  }
  0x32   :  { %70 = dma.hbm_to_vmem [thread:$0]  %s6247_s10, 4096, %s65_s30, [#allocation5], %s5768_s6, %s5768_s6, %s5769_s24  }
  0x33   :  { %5759 = dma.done.wait [#allocation3], 16128  }
  0x34   :  { %5760 = vsyncadd [#allocation3], 4294951168 }
  0x35   :  { %5761 = dma.done.wait [#allocation5], 20480  }
  0x36   :  { %5762 = vsyncadd [#allocation5], 4294946816  ;;  %v5770_v0 = vmov 0.0   ;;  %vm5771_vm0 = vmmov 0   ;;  %vm100_vm1 = vcmask 1044480   ;;  %vm90_vm2 = vcmask 39936  }
  0x37   :  { %5170 = vmatprep.subr.mxu0 %v5770_v0  ;;  %5172 = vmatprep.mubr.msk.f32.mxu0 %vm5771_vm0, %v5770_v0  ;;  %v89_v1 = vld [vmem:[%s6239_s2] sm:$0x1f]  ;;  %v87_v3 = vld [vmem:[%s6237_s0 + $0x8] sm:$0xff]  ;;  %v88_v4 = vld [vmem:[%s6237_s0 + $0x10] sm:$0x1f]  ;;  %v5772_v5 = vmov 0.0|0.0  }
  0x38   :  { %5187 = vmatprep.mubr.msk.f32.mxu1 %vm5771_vm0, %v5770_v0  ;;  %v86_v2 = vld [vmem:[%s6237_s0] sm:$0xff]  ;;  %5171 = vmatpush3.msk.msra.mxu0 %vm100_vm1, %v89_v1  ;;  %v285_v7 = vld [vmem:[%s6241_s4 + $0x8] sm:$0xff]  ;;  %vm191_vm3 = vcmask 171008   ;;  %v85_v18 = vld [vmem:[%s6238_s1 + $0x10] sm:$0x1f]  ;;  %vm540_vm4 = vcmask 1041408  }
  0x39   :  { %5173 = vmatmul.mubr.msk.f32.vlgmr.msra.gmra.mrb[0].mxu0 %vm90_vm2, %v86_v2  ;;  %5226 = vmatprep.subr.bf16.mxu1 %v5772_v5  ;;  %v284_v6 = vld [vmem:[%s6241_s4] sm:$0xff]  ;;  %v84_v17 = vld [vmem:[%s6238_s1 + $0x8] sm:$0xff]  ;;  %v286_v19 = vld [vmem:[%s6241_s4 + $0x10] sm:$0x1f]  ;;  %vm541_vm5 = vcmask 1042432   ;;  %v5773_v43 = vmov 65535  }
  0x3a   :  { %5175 = vmatprep.mubr.msk.f32.mxu0 %vm5771_vm0, %v5770_v0  ;;  %5229 = vmatprep.subr.bf16.mxu0 %v5772_v5  ;;  %v5230_v8 = vpack.c.bf16 %v285_v7, %v284_v6  ;;  %v83_v16 = vld [vmem:[%s6238_s1] sm:$0xff]  ;;  %v5262_v39 = vld [vmem:[#allocation2 + $0xc8] ss:$16 sps:$4 sm:$0xff]   ;;  %v5264_v40 = vld [vmem:[#allocation2 + $0xcc] ss:$16 sps:$4 sm:$0xff]   ;;  %v542_v44 = vsel %vm540_vm4, 4294967295, %v5773_v43 }
  0x3b   :  { %v4720_v20 = vld [vmem:[%s6240_s3] ss:$0 sm:$0xff]  ;;  %v5261_v38 = vld [vmem:[#allocation2 + $0xc4] ss:$16 sps:$4 sm:$0xff]   ;;  %v504_v45 = vld [vmem:[#allocation2 + $0xe8] sm:$0x77] }
  0x3c   :  { %5231 = vmatpush3.bf16.msra.mxu0 %v5230_v8  ;;  %v5259_v37 = vld [vmem:[#allocation2 + $0xc0] ss:$16 sps:$4 sm:$0xff]   ;;  %v5957_v47 = vsel %vm541_vm5, %v542_v44, 0  ;;  %v4740_v48 = vcombine.low %v504_v45, %v504_v45  ;;  %v4741_v49 = vcombine.high %v504_v45, %v504_v45  ;;  %v5774_v54 = vmov 0   ;;  %v5271_v55 = vld [vmem:[#allocation2 + $0x4] ss:$16 sps:$4 sm:$0xff]  }
  0x3d   :  { %5176 = vmatmul.mubr.msk.f32.gmra.mrb[2].mxu0 %vm90_vm2, %v87_v3  ;;  %5200 = vmatprep.subr.mxu0 %v5770_v0  ;;  %v503_v41 = vld [vmem:[#allocation2 + $0xe0] sm:$0x77]  ;;  %v5274_v56 = vld [vmem:[#allocation2 + $0xc] ss:$16 sps:$4 sm:$0xff]   ;;  %v5272_v6 = vld [vmem:[#allocation2 + $0x8] ss:$16 sps:$4 sm:$0xff]  }
  0x3e   :  { %5178 = vmatprep.mubr.msk.f32.mxu0 %vm5771_vm0, %v5770_v0  ;;  %v4739_v42 = vcombine.high %v503_v41, %v503_v41  ;;  %v4738_v46 = vcombine.low %v503_v41, %v503_v41  ;;  %v554_v51 = vand.u32 %v4741_v49, %v5957_v47  ;;  %v551_v53 = vand.u32 %v4740_v48, %v5957_v47  ;;  %v4729_v59 = vld [vmem:[%s6242_s5] ss:$0 sm:$0xff]  ;;  %v476_v61 = vld [vmem:[#allocation2 + $0x28] sm:$0x77] }
  0x3f   :  { %v475_v60 = vld [vmem:[#allocation2 + $0x20] sm:$0x77]  ;;  %v4751_v3 = vcombine.high %v476_v61, %v476_v61  ;;  %v4750_v8 = vcombine.low %v476_v61, %v476_v61 }
  0x40   :  { %5201 = vmatpush3.msk.msra.mxu0 %vm100_vm1, %v286_v19  ;;  %v548_v50 = vand.u32 %v4739_v42, %v5957_v47  ;;  %v545_v52 = vand.u32 %v4738_v46, %v5957_v47  ;;  %v4749_v2 = vcombine.high %v475_v60, %v475_v60  ;;  %v4748_v7 = vcombine.low %v475_v60, %v475_v60  ;;  %v5281_v19 = vld [vmem:[#allocation2 + $0xf4] ss:$16 sps:$4 sm:$0xff]   ;;  %v1035_v46 = vld [vmem:[#allocation2 + $0x148] sm:$0x77] }
  0x41   :  { %5179 = vmatmul.mubr.msk.f32.gmra.mrb[4].mxu0 %vm90_vm2, %v88_v4  ;;  %556 = vmatprep.subr.bf16.mxu0 %v5261_v38  ;;  %v5289_v38 = vld [vmem:[#allocation2 + $0x30] ss:$16 sps:$4 sm:$0xff]  }
  0x42   :  { %5202 = vmatprep.mubr.msk.f32.mxu0 %vm5771_vm0, %v5770_v0  ;;  %v1034_v45 = vld [vmem:[#allocation2 + $0x140] sm:$0x77] }
  0x43   :  { %v489_v61 = vld [vmem:[#allocation2 + $0x80] sm:$0x77] }
 0x10c   :  { %v170_v9 = vpop.f32.mrb[0].mxu0 }
 0x10d   :  { %v5174_v10 = vpop.f32.mrb[1].mxu0 }
 0x110   :  { %v175_v11 = vpop.f32.mrb[2].mxu0 }
 0x111   :  { %v5227_v12 = vpack.c.bf16 %v175_v11, %v170_v9  ;;  %v5177_v13 = vpop.f32.mrb[3].mxu0  ;;  %v675_v11 = vand.u32 %v4749_v2, %v5957_v47  ;;  %v5314_v2 = vld [vmem:[#allocation2 + $0x6c] ss:$16 sps:$4 sm:$0xff]  }
 0x113   :  { %5228 = vmatpush3.bf16.msra.mxu1 %v5227_v12  ;;  %v681_v12 = vand.u32 %v4751_v3, %v5957_v47  ;;  %v4789_v3 = vcombine.high %v489_v61, %v489_v61 }
 0x114   :  { %v180_v14 = vpop.f32.mrb[4].mxu0  ;;  %5185 = vmatprep.subr.mxu1 %v5770_v0 }
 0x115   :  { %v5180_v15 = vpop.f32.mrb[5].mxu0 }
 0x116   :  { %v771_v15 = vld [vmem:[#allocation2 + $0x118] sm:$0x77] }
 0x117   :  { %5186 = vmatpush3.msk.msra.mxu1 %vm100_vm1, %v180_v14  ;;  %v770_v14 = vld [vmem:[#allocation2 + $0x110] sm:$0x77] }
 0x118   :  { %5188 = vmatmul.mubr.msk.f32.vlgmr.msra.gmra.mrb[0].mxu1 %vm191_vm3, %v83_v16  ;;  %5232 = vmatprep.subr.bf16.mxu1 %v5772_v5  ;;  %v5269_v5 = vld [vmem:[#allocation2] ss:$16 sps:$4 sm:$0xff]  }
 0x119   :  { %5190 = vmatprep.mubr.msk.f32.mxu1 %vm5771_vm0, %v5770_v0 }
 0x11c   :  { %5191 = vmatmul.mubr.msk.f32.gmra.mrb[2].mxu1 %vm191_vm3, %v84_v17 }
 0x11d   :  { %5193 = vmatprep.mubr.msk.f32.mxu1 %vm5771_vm0, %v5770_v0 }
 0x120   :  { %5194 = vmatmul.mubr.msk.f32.gmra.mrb[4].mxu1 %vm191_vm3, %v85_v18 }
 0x121   :  { %5217 = vmatprep.mubr.msk.f32.mxu1 %vm5771_vm0, %v5770_v0 }
 0x1eb   :  { %v270_v21 = vpop.f32.mrb[0].mxu1 }
 0x1ec   :  { %v271_v22 = vadd.f32 %v4720_v20, %v270_v21  ;;  %v5189_v23 = vpop.f32.mrb[1].mxu1  ;;  %v4759_v21 = vcombine.high %v770_v14, %v770_v14 }
 0x1ed   :  { %v5279_v23 = vld [vmem:[#allocation2 + $0xf0] ss:$16 sps:$4 sm:$0xff]  }
 0x1ee   :  { %5203 = vmatmul.mubr.msk.f32.vlgmr.msra.gmra.mrb[6].mxu0 %vm191_vm3, %v271_v22  ;;  %v4761_v22 = vcombine.high %v771_v15, %v771_v15 }
 0x1ef   :  { %v275_v24 = vpop.f32.mrb[2].mxu1  ;;  %5205 = vmatprep.mubr.msk.f32.mxu0 %vm5771_vm0, %v5770_v0  ;;  %557 = vmatpush1.bf16.msra.mxu0 %v5259_v37 }
 0x1f0   :  { %v276_v25 = vadd.f32 %v4720_v20, %v275_v24  ;;  %v5192_v26 = vpop.f32.mrb[3].mxu1  ;;  %558 = vmatprep.subr.bf16.mxu0 %v548_v50  ;;  %v5282_v24 = vld [vmem:[#allocation2 + $0xf8] ss:$16 sps:$4 sm:$0xff]   ;;  %v5301_v50 = vld [vmem:[#allocation2 + $0x124] ss:$16 sps:$4 sm:$0xff]  }
 0x1f1   :  { %v4760_v26 = vcombine.low %v771_v15, %v771_v15 }
 0x1f2   :  { %5206 = vmatmul.mubr.msk.f32.gmra.mrb[8].mxu0 %vm191_vm3, %v276_v25  ;;  %v4758_v25 = vcombine.low %v770_v14, %v770_v14  ;;  %v1298_v14 = vld [vmem:[#allocation2 + $0x178] sm:$0x77] }
 0x1f3   :  { %v280_v27 = vpop.f32.mrb[4].mxu1  ;;  %5208 = vmatprep.mubr.msk.f32.mxu0 %vm5771_vm0, %v5770_v0  ;;  %559 = vmatpush1.bf16.msra.mxu0 %v545_v52  ;;  %v4779_v52 = vcombine.high %v1034_v45, %v1034_v45 }
 0x1f4   :  { %v281_v28 = vadd.f32 %v4720_v20, %v280_v27  ;;  %v5195_v29 = vpop.f32.mrb[5].mxu1  ;;  %683 = vmatprep.subr.bf16.mxu0 %v5271_v55  ;;  %v5284_v20 = vld [vmem:[#allocation2 + $0xfc] ss:$16 sps:$4 sm:$0xff]   ;;  %v812_v27 = vand.u32 %v4759_v21, %v5957_v47  ;;  %v5299_v55 = vld [vmem:[#allocation2 + $0x120] ss:$16 sps:$4 sm:$0xff]   ;;  %v4801_v21 = vcombine.high %v1298_v14, %v1298_v14 }
 0x1f5   :  { %v482_v29 = vld [vmem:[#allocation2 + $0x50] sm:$0x77] }
 0x1f6   :  { %5209 = vmatmul.mubr.msk.f32.gmra.mrb[10].mxu0 %vm191_vm3, %v281_v28  ;;  %v818_v28 = vand.u32 %v4761_v22, %v5957_v47  ;;  %v5319_v22 = vld [vmem:[#allocation2 + $0x150] ss:$16 sps:$4 sm:$0xff]  }
 0x1f7   :  { %588 = vmatprep.mubr.bf16.mxu0 %v5774_v54 }
 0x2c1   :  { %v365_v30 = vpop.f32.mrb[6].mxu0 }
 0x2c2   :  { %v5204_v31 = vpop.f32.mrb[7].mxu0 }
 0x2c3   :  { %v809_v31 = vand.u32 %v4758_v25, %v5957_v47  ;;  %v4800_v25 = vcombine.low %v1298_v14, %v1298_v14  ;;  %v1838_v14 = vld [vmem:[#allocation2 + $0x200] sm:$0x77] }
 0x2c5   :  { %v370_v32 = vpop.f32.mrb[8].mxu0 }
 0x2c6   :  { %v5233_v33 = vpack.c.bf16 %v370_v32, %v365_v30  ;;  %v5207_v34 = vpop.f32.mrb[9].mxu0  ;;  %v483_v30 = vld [vmem:[#allocation2 + $0x58] sm:$0x77]  ;;  %v815_v32 = vand.u32 %v4760_v26, %v5957_v47 }
 0x2c7   :  { %v5291_v34 = vld [vmem:[#allocation2 + $0x34] ss:$16 sps:$4 sm:$0xff]   ;;  %v4771_v37 = vcombine.high %v483_v30, %v483_v30  ;;  %v4770_v41 = vcombine.low %v483_v30, %v483_v30  ;;  %v497_v30 = vld [vmem:[#allocation2 + $0xb8] sm:$0x77] }
 0x2c8   :  { %5234 = vmatpush3.bf16.msra.mxu1 %v5233_v33 }
 0x2c9   :  { %v375_v35 = vpop.f32.mrb[10].mxu0  ;;  %5215 = vmatprep.subr.mxu1 %v5770_v0  ;;  %v945_v44 = vand.u32 %v4771_v37, %v5957_v47  ;;  %v942_v49 = vand.u32 %v4770_v41, %v5957_v47  ;;  %v4811_v37 = vcombine.high %v497_v30, %v497_v30  ;;  %v4810_v41 = vcombine.low %v497_v30, %v497_v30  ;;  %v1977_v30 = vld [vmem:[#allocation2 + $0x230] sm:$0x77] }
 0x2ca   :  { %v5210_v36 = vpop.f32.mrb[11].mxu0 }
 0x2cb   :  { %v4769_v36 = vcombine.high %v482_v29, %v482_v29 }
 0x2cc   :  { %5216 = vmatpush3.msk.msra.mxu1 %vm100_vm1, %v375_v35  ;;  %v5294_v35 = vld [vmem:[#allocation2 + $0x3c] ss:$16 sps:$4 sm:$0xff]  }
 0x2cd   :  { %5218 = vmatmul.mubr.msk.f32.vlgmr.msra.gmra.mrb[6].mxu1 %vm191_vm3, %v83_v16  ;;  %597 = vmatprep.subr.bf16.mxu1 %v5264_v40  ;;  %v672_v16 = vand.u32 %v4748_v7, %v5957_v47  ;;  %v4768_v40 = vcombine.low %v482_v29, %v482_v29  ;;  %v939_v43 = vand.u32 %v4769_v36, %v5957_v47  ;;  %v5312_v7 = vld [vmem:[#allocation2 + $0x68] ss:$16 sps:$4 sm:$0xff]   ;;  %v496_v29 = vld [vmem:[#allocation2 + $0xb0] sm:$0x77] }
 0x2ce   :  { %5220 = vmatprep.mubr.msk.f32.mxu1 %vm5771_vm0, %v5770_v0  ;;  %598 = vmatpush1.bf16.msra.mxu1 %v5262_v39  ;;  %v5292_v39 = vld [vmem:[#allocation2 + $0x38] ss:$16 sps:$4 sm:$0xff]   ;;  %v4809_v36 = vcombine.high %v496_v29, %v496_v29 }
 0x2cf   :  { %599 = vmatprep.subr.bf16.mxu1 %v554_v51  ;;  %v936_v48 = vand.u32 %v4768_v40, %v5957_v47  ;;  %v5304_v51 = vld [vmem:[#allocation2 + $0x12c] ss:$16 sps:$4 sm:$0xff]   ;;  %v4808_v40 = vcombine.low %v496_v29, %v496_v29 }
 0x2d1   :  { %5221 = vmatmul.mubr.msk.f32.gmra.mrb[8].mxu1 %vm191_vm3, %v84_v17  ;;  %v678_v17 = vand.u32 %v4750_v8, %v5957_v47  ;;  %v4788_v8 = vcombine.low %v489_v61, %v489_v61 }
 0x2d2   :  { %5223 = vmatprep.mubr.msk.f32.mxu1 %vm5771_vm0, %v5770_v0  ;;  %600 = vmatpush1.bf16.msra.mxu1 %v551_v53  ;;  %v4781_v53 = vcombine.high %v1035_v46, %v1035_v46 }
 0x2d3   :  { %724 = vmatprep.subr.bf16.mxu1 %v5274_v56  ;;  %v5302_v56 = vld [vmem:[#allocation2 + $0x128] ss:$16 sps:$4 sm:$0xff]   ;;  %v1199_v15 = vand.u32 %v4788_v8, %v5957_v47 }
 0x2d4   :  { %v1080_v60 = vand.u32 %v4781_v53, %v5957_v47  ;;  %v5352_v8 = vld [vmem:[#allocation2 + $0x1b8] ss:$16 sps:$4 sm:$0xff]  }
 0x2d5   :  { %5224 = vmatmul.mubr.msk.f32.gmra.mrb[10].mxu1 %vm191_vm3, %v85_v18 }
 0x2d6   :  { %629 = vmatprep.mubr.bf16.mxu1 %v5774_v54 }
 0x3a0   :  { %v455_v57 = vpop.f32.mrb[6].mxu1 }
 0x3a1   :  { %v5219_v58 = vpop.f32.mrb[7].mxu1  ;;  %v456_v63 = vadd.f32 %v4729_v59, %v455_v57  ;;  %v4778_v57 = vcombine.low %v1034_v45, %v1034_v45  ;;  %v1560_v45 = vld [vmem:[#allocation2 + $0x1a0] sm:$0x77] }
 0x3a2   :  { %v4780_v58 = vcombine.low %v1035_v46, %v1035_v46  ;;  %v1561_v46 = vld [vmem:[#allocation2 + $0x1a8] sm:$0x77] }
 0x3a3   :  { %v4821_v53 = vcombine.high %v1561_v46, %v1561_v46 }
 0x3a4   :  { %v460_v62 = vpop.f32.mrb[8].mxu1 }
 0x3a5   :  { %v461_v0 = vadd.f32 %v4729_v59, %v460_v62  ;;  %v5222_v1 = vpop.f32.mrb[9].mxu1  ;;  %v490_v62 = vld [vmem:[#allocation2 + $0x88] sm:$0x77]  ;;  %v1606_v61 = vand.u32 %v4821_v53, %v5957_v47 }
 0x3a6   :  { %v5311_v1 = vld [vmem:[#allocation2 + $0x64] ss:$16 sps:$4 sm:$0xff]  }
 0x3a7   :  { %v5968_v4 = vpack.c.bf16 %v461_v0, %v456_v63  ;;  %v1071_v63 = vand.u32 %v4778_v57, %v5957_v47  ;;  %v1077_v0 = vand.u32 %v4780_v58, %v5957_v47  ;;  %v4818_v57 = vcombine.low %v1560_v45, %v1560_v45 }
 0x3a8   :  { %v465_v9 = vpop.f32.mrb[10].mxu1  ;;  %v4820_v58 = vcombine.low %v1561_v46, %v1561_v46  ;;  %v2116_v46 = vld [vmem:[#allocation2 + $0x260] sm:$0x77] }
 0x3a9   :  { %v506_v10 = vrot.slane %v5968_v4, 2  ;;  %v5225_v13 = vpop.f32.mrb[11].mxu1  ;;  %v5977_v18 = vadd.f32 %v4729_v59, %v465_v9  ;;  %v5990_v33 = vshrl.u32 %v5968_v4, 16  ;;  %v1074_v59 = vand.u32 %v4779_v52, %v5957_v47 }
 0x3aa   :  { %v4790_v9 = vcombine.low %v490_v62, %v490_v62  ;;  %v1297_v13 = vld [vmem:[#allocation2 + $0x170] sm:$0x77]  ;;  %v1164_v26 = vrot.slane %v5968_v4, 1  ;;  %v4819_v52 = vcombine.high %v1560_v45, %v1560_v45  ;;  %v4859_v53 = vcombine.high %v2116_v46, %v2116_v46 }
 0x3ab   :  { %4742 = vmatmul.mubr.msk.bf16.vlgmr.msra.gmra.mrb[12].mxu0 %vm191_vm3, %v506_v10  ;;  %4743 = vmatmul.mubr.msk.bf16.vlgmr.msra.gmra.mrb[12].mxu1 %vm191_vm3, %v506_v10  ;;  %v774_v42 = vrot.slane %v5990_v33, 2  ;;  %v1036_v10 = vrot.slane %v5968_v4, 3 }
 0x3ac   :  { %684 = vmatpush1.bf16.msra.mxu0 %v5269_v5  ;;  %725 = vmatpush1.bf16.msra.mxu1 %v5272_v6  ;;  %v4791_v5 = vcombine.high %v490_v62, %v490_v62  ;;  %v5309_v6 = vld [vmem:[#allocation2 + $0x60] ss:$16 sps:$4 sm:$0xff]  }
 0x3ad   :  { %685 = vmatprep.subr.bf16.mxu0 %v675_v11  ;;  %726 = vmatprep.subr.bf16.mxu1 %v681_v12  ;;  %v1202_v11 = vand.u32 %v4789_v3, %v5957_v47  ;;  %v1699_v62 = vld [vmem:[#allocation2 + $0x1d0] sm:$0x77]  ;;  %v5354_v3 = vld [vmem:[#allocation2 + $0x1bc] ss:$16 sps:$4 sm:$0xff]  }
 0x3ae   :  { %715 = vmatprep.mubr.bf16.mxu0 %v5774_v54  ;;  %756 = vmatprep.mubr.bf16.mxu1 %v5774_v54  ;;  %v1208_v12 = vand.u32 %v4791_v5, %v5957_v47  ;;  %v4829_v5 = vcombine.high %v1699_v62, %v1699_v62 }
 0x3b0   :  { %686 = vmatpush1.bf16.msra.mxu0 %v672_v16  ;;  %727 = vmatpush1.bf16.msra.mxu1 %v678_v17  ;;  %v1205_v16 = vand.u32 %v4790_v9, %v5957_v47  ;;  %v5321_v17 = vld [vmem:[#allocation2 + $0x154] ss:$16 sps:$4 sm:$0xff]   ;;  %v4828_v9 = vcombine.low %v1699_v62, %v1699_v62 }
 0x3b1   :  { %820 = vmatprep.subr.bf16.mxu0 %v5281_v19  ;;  %861 = vmatprep.subr.bf16.mxu1 %v5284_v20  ;;  %v5324_v19 = vld [vmem:[#allocation2 + $0x15c] ss:$16 sps:$4 sm:$0xff]   ;;  %v4799_v20 = vcombine.high %v1297_v13, %v1297_v13 }
 0x3b3   :  { %4752 = vmatmul.mubr.msk.bf16.vlgmr.msra.gmra.mrb[16].mxu0 %vm191_vm3, %v5968_v4  ;;  %4753 = vmatmul.mubr.msk.bf16.vlgmr.msra.gmra.mrb[16].mxu1 %vm191_vm3, %v5968_v4 }
 0x3b4   :  { %821 = vmatpush1.bf16.msra.mxu0 %v5279_v23  ;;  %862 = vmatpush1.bf16.msra.mxu1 %v5282_v24  ;;  %v5322_v23 = vld [vmem:[#allocation2 + $0x158] ss:$16 sps:$4 sm:$0xff]   ;;  %v4798_v24 = vcombine.low %v1297_v13, %v1297_v13 }
 0x3b5   :  { %822 = vmatprep.subr.bf16.mxu0 %v812_v27  ;;  %863 = vmatprep.subr.bf16.mxu1 %v818_v28  ;;  %v1337_v27 = vand.u32 %v4799_v20, %v5957_v47  ;;  %v1343_v28 = vand.u32 %v4801_v21, %v5957_v47  ;;  %v5364_v20 = vld [vmem:[#allocation2 + $0x1ec] ss:$16 sps:$4 sm:$0xff]   ;;  %v4839_v21 = vcombine.high %v1838_v14, %v1838_v14 }
 0x3b6   :  { %852 = vmatprep.mubr.bf16.mxu0 %v5774_v54  ;;  %893 = vmatprep.mubr.bf16.mxu1 %v5774_v54 }
 0x3b8   :  { %823 = vmatpush1.bf16.msra.mxu0 %v809_v31  ;;  %864 = vmatpush1.bf16.msra.mxu1 %v815_v32  ;;  %v1334_v31 = vand.u32 %v4798_v24, %v5957_v47  ;;  %v1340_v32 = vand.u32 %v4800_v25, %v5957_v47  ;;  %v5362_v24 = vld [vmem:[#allocation2 + $0x1e8] ss:$16 sps:$4 sm:$0xff]   ;;  %v4838_v25 = vcombine.low %v1838_v14, %v1838_v14 }
 0x3b9   :  { %947 = vmatprep.subr.bf16.mxu0 %v5291_v34  ;;  %988 = vmatprep.subr.bf16.mxu1 %v5294_v35  ;;  %v5331_v34 = vld [vmem:[#allocation2 + $0x94] ss:$16 sps:$4 sm:$0xff]   ;;  %v5334_v35 = vld [vmem:[#allocation2 + $0x9c] ss:$16 sps:$4 sm:$0xff]  }
 0x3bb   :  { %4762 = vmatmul.mubr.msk.bf16.vlgmr.msra.gmra.mrb[20].mxu0 %vm191_vm3, %v774_v42  ;;  %4763 = vmatmul.mubr.msk.bf16.vlgmr.msra.gmra.mrb[20].mxu1 %vm191_vm3, %v774_v42  ;;  %v1299_v42 = vrot.slane %v5990_v33, 3 }
 0x3bc   :  { %948 = vmatpush1.bf16.msra.mxu0 %v5289_v38  ;;  %989 = vmatpush1.bf16.msra.mxu1 %v5292_v39  ;;  %v5329_v38 = vld [vmem:[#allocation2 + $0x90] ss:$16 sps:$4 sm:$0xff]   ;;  %v5332_v39 = vld [vmem:[#allocation2 + $0x98] ss:$16 sps:$4 sm:$0xff]  }
 0x3bd   :  { %949 = vmatprep.subr.bf16.mxu0 %v939_v43  ;;  %990 = vmatprep.subr.bf16.mxu1 %v945_v44  ;;  %v1465_v43 = vand.u32 %v4809_v36, %v5957_v47  ;;  %v1471_v44 = vand.u32 %v4811_v37, %v5957_v47  ;;  %v5374_v36 = vld [vmem:[#allocation2 + $0x21c] ss:$16 sps:$4 sm:$0xff]   ;;  %v4849_v37 = vcombine.high %v1977_v30, %v1977_v30 }
 0x3be   :  { %979 = vmatprep.mubr.bf16.mxu0 %v5774_v54  ;;  %1020 = vmatprep.mubr.bf16.mxu1 %v5774_v54 }
 0x3c0   :  { %950 = vmatpush1.bf16.msra.mxu0 %v936_v48  ;;  %991 = vmatpush1.bf16.msra.mxu1 %v942_v49  ;;  %v1462_v48 = vand.u32 %v4808_v40, %v5957_v47  ;;  %v1468_v49 = vand.u32 %v4810_v41, %v5957_v47  ;;  %v5372_v40 = vld [vmem:[#allocation2 + $0x218] ss:$16 sps:$4 sm:$0xff]   ;;  %v4848_v41 = vcombine.low %v1977_v30, %v1977_v30 }
 0x3c1   :  { %1082 = vmatprep.subr.bf16.mxu0 %v5301_v50  ;;  %1123 = vmatprep.subr.bf16.mxu1 %v5304_v51  ;;  %v5341_v50 = vld [vmem:[#allocation2 + $0x184] ss:$16 sps:$4 sm:$0xff]   ;;  %v5344_v51 = vld [vmem:[#allocation2 + $0x18c] ss:$16 sps:$4 sm:$0xff]  }
 0x3c3   :  { %4772 = vmatmul.mubr.msk.bf16.vlgmr.msra.gmra.mrb[24].mxu0 %vm191_vm3, %v5990_v33  ;;  %4773 = vmatmul.mubr.msk.bf16.vlgmr.msra.gmra.mrb[24].mxu1 %vm191_vm3, %v5990_v33 }
 0x3c4   :  { %1083 = vmatpush1.bf16.msra.mxu0 %v5299_v55  ;;  %1124 = vmatpush1.bf16.msra.mxu1 %v5302_v56  ;;  %v5339_v55 = vld [vmem:[#allocation2 + $0x180] ss:$16 sps:$4 sm:$0xff]   ;;  %v5342_v56 = vld [vmem:[#allocation2 + $0x188] ss:$16 sps:$4 sm:$0xff]  }
 0x3c5   :  { %1084 = vmatprep.subr.bf16.mxu0 %v1074_v59  ;;  %1125 = vmatprep.subr.bf16.mxu1 %v1080_v60  ;;  %v1427_v59 = vrot.slane %v5990_v33, 1  ;;  %v1600_v60 = vand.u32 %v4819_v52, %v5957_v47  ;;  %v5384_v52 = vld [vmem:[#allocation2 + $0x24c] ss:$16 sps:$4 sm:$0xff]  }
 0x3c6   :  { %1114 = vmatprep.mubr.bf16.mxu0 %v5774_v54  ;;  %1155 = vmatprep.mubr.bf16.mxu1 %v5774_v54 }
 0x3c8   :  { %1085 = vmatpush1.bf16.msra.mxu0 %v1071_v63  ;;  %1126 = vmatpush1.bf16.msra.mxu1 %v1077_v0  ;;  %v1700_v63 = vld [vmem:[#allocation2 + $0x1d8] sm:$0x77]  ;;  %v1597_v0 = vand.u32 %v4818_v57, %v5957_v47 }
 0x3c9   :  { %1210 = vmatprep.subr.bf16.mxu0 %v5311_v1  ;;  %1251 = vmatprep.subr.bf16.mxu1 %v5314_v2  ;;  %v1603_v1 = vand.u32 %v4820_v58, %v5957_v47  ;;  %v5351_v2 = vld [vmem:[#allocation2 + $0x1b4] ss:$16 sps:$4 sm:$0xff]   ;;  %v5382_v57 = vld [vmem:[#allocation2 + $0x248] ss:$16 sps:$4 sm:$0xff]   ;;  %v4858_v58 = vcombine.low %v2116_v46, %v2116_v46 }
 0x3cb   :  { %4782 = vmatmul.mubr.msk.bf16.vlgmr.msra.gmra.mrb[28].mxu0 %vm191_vm3, %v1036_v10  ;;  %4783 = vmatmul.mubr.msk.bf16.vlgmr.msra.gmra.mrb[28].mxu1 %vm191_vm3, %v1036_v10  ;;  %v4830_v10 = vcombine.low %v1700_v63, %v1700_v63 }
 0x3cc   :  { %1211 = vmatpush1.bf16.msra.mxu0 %v5309_v6  ;;  %1252 = vmatpush1.bf16.msra.mxu1 %v5312_v7  ;;  %v4831_v6 = vcombine.high %v1700_v63, %v1700_v63  ;;  %v5349_v7 = vld [vmem:[#allocation2 + $0x1b0] ss:$16 sps:$4 sm:$0xff]  }
 0x3cd   :  { %1212 = vmatprep.subr.bf16.mxu0 %v1202_v11  ;;  %1253 = vmatprep.subr.bf16.mxu1 %v1208_v12  ;;  %v1562_v11 = vrot.slane %v5968_v4, 4  ;;  %v1739_v12 = vand.u32 %v4829_v5, %v5957_v47  ;;  %v2255_v63 = vld [vmem:[#allocation2 + $0x290] sm:$0x77]  ;;  %v5394_v5 = vld [vmem:[#allocation2 + $0x27c] ss:$16 sps:$4 sm:$0xff]  }
 0x3ce   :  { %1242 = vmatprep.mubr.bf16.mxu0 %v5774_v54  ;;  %1283 = vmatprep.mubr.bf16.mxu1 %v5774_v54  ;;  %v1745_v13 = vand.u32 %v4831_v6, %v5957_v47  ;;  %v4869_v6 = vcombine.high %v2255_v63, %v2255_v63 }
 0x3d0   :  { %1213 = vmatpush1.bf16.msra.mxu0 %v1199_v15  ;;  %1254 = vmatpush1.bf16.msra.mxu1 %v1205_v16  ;;  %v1839_v15 = vld [vmem:[#allocation2 + $0x208] sm:$0x77]  ;;  %v1736_v16 = vand.u32 %v4828_v9, %v5957_v47 }
 0x3d1   :  { %1345 = vmatprep.subr.bf16.mxu0 %v5321_v17  ;;  %1386 = vmatprep.subr.bf16.mxu1 %v5324_v19  ;;  %v1742_v17 = vand.u32 %v4830_v10, %v5957_v47  ;;  %v5361_v19 = vld [vmem:[#allocation2 + $0x1e4] ss:$16 sps:$4 sm:$0xff]   ;;  %v5392_v9 = vld [vmem:[#allocation2 + $0x278] ss:$16 sps:$4 sm:$0xff]   ;;  %v4868_v10 = vcombine.low %v2255_v63, %v2255_v63 }
 0x3d2   :  { %v2810_v63 = vld [vmem:[#allocation2 + $0x350] sm:$0x77] }
 0x3d3   :  { %4792 = vmatmul.mubr.msk.bf16.vlgmr.msra.gmra.mrb[32].mxu0 %vm191_vm3, %v1164_v26  ;;  %4793 = vmatmul.mubr.msk.bf16.vlgmr.msra.gmra.mrb[32].mxu1 %vm191_vm3, %v1164_v26  ;;  %v4840_v26 = vcombine.low %v1839_v15, %v1839_v15 }
 0x3d4   :  { %1346 = vmatpush1.bf16.msra.mxu0 %v5319_v22  ;;  %1387 = vmatpush1.bf16.msra.mxu1 %v5322_v23  ;;  %v4841_v22 = vcombine.high %v1839_v15, %v1839_v15  ;;  %v5359_v23 = vld [vmem:[#allocation2 + $0x1e0] ss:$16 sps:$4 sm:$0xff]  }
 0x3d5   :  { %1347 = vmatprep.subr.bf16.mxu0 %v1337_v27  ;;  %1388 = vmatprep.subr.bf16.mxu1 %v1343_v28  ;;  %v1701_v27 = vrot.slane %v5990_v33, 4  ;;  %v1878_v28 = vand.u32 %v4839_v21, %v5957_v47  ;;  %v2394_v15 = vld [vmem:[#allocation2 + $0x2c0] sm:$0x77]  ;;  %v5404_v21 = vld [vmem:[#allocation2 + $0x2ac] ss:$16 sps:$4 sm:$0xff]  }
 0x3d6   :  { %1377 = vmatprep.mubr.bf16.mxu0 %v5774_v54  ;;  %1418 = vmatprep.mubr.bf16.mxu1 %v5774_v54  ;;  %v1884_v29 = vand.u32 %v4841_v22, %v5957_v47  ;;  %v4879_v22 = vcombine.high %v2394_v15, %v2394_v15 }
 0x3d8   :  { %1348 = vmatpush1.bf16.msra.mxu0 %v1334_v31  ;;  %1389 = vmatpush1.bf16.msra.mxu1 %v1340_v32  ;;  %v1978_v31 = vld [vmem:[#allocation2 + $0x238] sm:$0x77]  ;;  %v1875_v32 = vand.u32 %v4838_v25, %v5957_v47 }
 0x3d9   :  { %1473 = vmatprep.subr.bf16.mxu0 %v5331_v34  ;;  %1514 = vmatprep.subr.bf16.mxu1 %v5334_v35  ;;  %v1881_v34 = vand.u32 %v4840_v26, %v5957_v47  ;;  %v5371_v35 = vld [vmem:[#allocation2 + $0x214] ss:$16 sps:$4 sm:$0xff]   ;;  %v5402_v25 = vld [vmem:[#allocation2 + $0x2a8] ss:$16 sps:$4 sm:$0xff]   ;;  %v4878_v26 = vcombine.low %v2394_v15, %v2394_v15 }
 0x3da   :  { %v2951_v15 = vld [vmem:[#allocation2 + $0x388] sm:$0x77] }
 0x3db   :  { %4802 = vmatmul.mubr.msk.bf16.vlgmr.msra.gmra.mrb[36].mxu0 %vm191_vm3, %v1299_v42  ;;  %4803 = vmatmul.mubr.msk.bf16.vlgmr.msra.gmra.mrb[36].mxu1 %vm191_vm3, %v1299_v42  ;;  %v4850_v42 = vcombine.low %v1978_v31, %v1978_v31 }
 0x3dc   :  { %1474 = vmatpush1.bf16.msra.mxu0 %v5329_v38  ;;  %1515 = vmatpush1.bf16.msra.mxu1 %v5332_v39  ;;  %v4851_v38 = vcombine.high %v1978_v31, %v1978_v31  ;;  %v5369_v39 = vld [vmem:[#allocation2 + $0x210] ss:$16 sps:$4 sm:$0xff]  }
 0x3dd   :  { %1475 = vmatprep.subr.bf16.mxu0 %v1465_v43  ;;  %1516 = vmatprep.subr.bf16.mxu1 %v1471_v44  ;;  %v1840_v43 = vrot.slane %v5968_v4, 5  ;;  %v2017_v44 = vand.u32 %v4849_v37, %v5957_v47  ;;  %v2533_v31 = vld [vmem:[#allocation2 + $0x2f0] sm:$0x77]  ;;  %v5414_v37 = vld [vmem:[#allocation2 + $0x2dc] ss:$16 sps:$4 sm:$0xff]  }
 0x3de   :  { %1505 = vmatprep.mubr.bf16.mxu0 %v5774_v54  ;;  %1546 = vmatprep.mubr.bf16.mxu1 %v5774_v54  ;;  %v2023_v45 = vand.u32 %v4851_v38, %v5957_v47  ;;  %v4889_v38 = vcombine.high %v2533_v31, %v2533_v31 }
 0x3e0   :  { %1476 = vmatpush1.bf16.msra.mxu0 %v1462_v48  ;;  %1517 = vmatpush1.bf16.msra.mxu1 %v1468_v49  ;;  %v2117_v48 = vld [vmem:[#allocation2 + $0x268] sm:$0x77]  ;;  %v2014_v49 = vand.u32 %v4848_v41, %v5957_v47 }
 0x3e1   :  { %1608 = vmatprep.subr.bf16.mxu0 %v5341_v50  ;;  %1649 = vmatprep.subr.bf16.mxu1 %v5344_v51  ;;  %v2020_v50 = vand.u32 %v4850_v42, %v5957_v47  ;;  %v5381_v51 = vld [vmem:[#allocation2 + $0x244] ss:$16 sps:$4 sm:$0xff]   ;;  %v5412_v41 = vld [vmem:[#allocation2 + $0x2d8] ss:$16 sps:$4 sm:$0xff]   ;;  %v4888_v42 = vcombine.low %v2533_v31, %v2533_v31 }
 0x3e3   :  { %4812 = vmatmul.mubr.msk.bf16.vlgmr.msra.gmra.mrb[40].mxu0 %vm191_vm3, %v1427_v59  ;;  %4813 = vmatmul.mubr.msk.bf16.vlgmr.msra.gmra.mrb[40].mxu1 %vm191_vm3, %v1427_v59  ;;  %v4860_v59 = vcombine.low %v2117_v48, %v2117_v48 }
 0x3e4   :  { %1609 = vmatpush1.bf16.msra.mxu0 %v5339_v55  ;;  %1650 = vmatpush1.bf16.msra.mxu1 %v5342_v56  ;;  %v4861_v55 = vcombine.high %v2117_v48, %v2117_v48  ;;  %v5379_v56 = vld [vmem:[#allocation2 + $0x240] ss:$16 sps:$4 sm:$0xff]  }
 0x3e5   :  { %1610 = vmatprep.subr.bf16.mxu0 %v1600_v60  ;;  %1651 = vmatprep.subr.bf16.mxu1 %v1606_v61  ;;  %v1979_v60 = vrot.slane %v5990_v33, 5  ;;  %v2156_v61 = vand.u32 %v4859_v53, %v5957_v47  ;;  %v2672_v48 = vld [vmem:[#allocation2 + $0x320] sm:$0x77] }
 0x3e6   :  { %1640 = vmatprep.mubr.bf16.mxu0 %v5774_v54  ;;  %1681 = vmatprep.mubr.bf16.mxu1 %v5774_v54  ;;  %v2162_v62 = vand.u32 %v4861_v55, %v5957_v47  ;;  %v4899_v53 = vcombine.high %v2672_v48, %v2672_v48 }
 0x3e8   :  { %1611 = vmatpush1.bf16.msra.mxu0 %v1597_v0  ;;  %1652 = vmatpush1.bf16.msra.mxu1 %v1603_v1  ;;  %v2256_v0 = vld [vmem:[#allocation2 + $0x298] sm:$0x77]  ;;  %v2153_v1 = vand.u32 %v4858_v58, %v5957_v47  ;;  %v4898_v58 = vcombine.low %v2672_v48, %v2672_v48 }
 0x3e9   :  { %1747 = vmatprep.subr.bf16.mxu0 %v5351_v2  ;;  %1788 = vmatprep.subr.bf16.mxu1 %v5354_v3  ;;  %v2159_v2 = vand.u32 %v4860_v59, %v5957_v47  ;;  %v5391_v3 = vld [vmem:[#allocation2 + $0x274] ss:$16 sps:$4 sm:$0xff]  }
 0x3eb   :  { %4822 = vmatmul.mubr.msk.bf16.vlgmr.msra.gmra.mrb[44].mxu0 %vm191_vm3, %v1562_v11  ;;  %4823 = vmatmul.mubr.msk.bf16.vlgmr.msra.gmra.mrb[44].mxu1 %vm191_vm3, %v1562_v11  ;;  %v4870_v11 = vcombine.low %v2256_v0, %v2256_v0 }
 0x3ec   :  { %1748 = vmatpush1.bf16.msra.mxu0 %v5349_v7  ;;  %1789 = vmatpush1.bf16.msra.mxu1 %v5352_v8  ;;  %v4871_v7 = vcombine.high %v2256_v0, %v2256_v0  ;;  %v5389_v8 = vld [vmem:[#allocation2 + $0x270] ss:$16 sps:$4 sm:$0xff]   ;;  %v2811_v0 = vld [vmem:[#allocation2 + $0x358] sm:$0x77] }
 0x3ed   :  { %1749 = vmatprep.subr.bf16.mxu0 %v1739_v12  ;;  %1790 = vmatprep.subr.bf16.mxu1 %v1745_v13  ;;  %v2118_v12 = vrot.slane %v5968_v4, 6  ;;  %v2295_v13 = vand.u32 %v4869_v6, %v5957_v47  ;;  %v4911_v6 = vcombine.high %v2811_v0, %v2811_v0 }
 0x3ee   :  { %1779 = vmatprep.mubr.bf16.mxu0 %v5774_v54  ;;  %1820 = vmatprep.mubr.bf16.mxu1 %v5774_v54  ;;  %v2301_v14 = vand.u32 %v4871_v7, %v5957_v47  ;;  %v6123_v7 = vpack.c.bf16 %v5977_v18, %v5977_v18 }
 0x3f0   :  { %1750 = vmatpush1.bf16.msra.mxu0 %v1736_v16  ;;  %1791 = vmatpush1.bf16.msra.mxu1 %v1742_v17  ;;  %v2395_v16 = vld [vmem:[#allocation2 + $0x2c8] sm:$0x77]  ;;  %v2292_v17 = vand.u32 %v4868_v10, %v5957_v47  ;;  %v4908_v10 = vcombine.low %v2810_v63, %v2810_v63 }
 0x3f1   :  { %1886 = vmatprep.subr.bf16.mxu0 %v5361_v19  ;;  %1927 = vmatprep.subr.bf16.mxu1 %v5364_v20  ;;  %v2298_v19 = vand.u32 %v4870_v11, %v5957_v47  ;;  %v5401_v20 = vld [vmem:[#allocation2 + $0x2a4] ss:$16 sps:$4 sm:$0xff]   ;;  %v4910_v11 = vcombine.low %v2811_v0, %v2811_v0 }
 0x3f2   :  { %v2848_v18 = vand.u32 %v4908_v10, %v5957_v47  ;;  %v5471_v0 = vld [vmem:[#allocation4 + $0x4] ss:$16 sps:$4 sm:$0xff]   ;;  %v5487_v10 = vld [vmem:[#allocation4 + $0x60] ss:$16 sps:$4 sm:$0xff]  }
 0x3f3   :  { %4832 = vmatmul.mubr.msk.bf16.vlgmr.msra.gmra.mrb[48].mxu0 %vm191_vm3, %v1701_v27  ;;  %4833 = vmatmul.mubr.msk.bf16.vlgmr.msra.gmra.mrb[48].mxu1 %vm191_vm3, %v1701_v27  ;;  %v4880_v27 = vcombine.low %v2395_v16, %v2395_v16 }
 0x3f4   :  { %1887 = vmatpush1.bf16.msra.mxu0 %v5359_v23  ;;  %1928 = vmatpush1.bf16.msra.mxu1 %v5362_v24  ;;  %v4881_v23 = vcombine.high %v2395_v16, %v2395_v16  ;;  %v5399_v24 = vld [vmem:[#allocation2 + $0x2a0] ss:$16 sps:$4 sm:$0xff]   ;;  %v2854_v16 = vand.u32 %v4910_v11, %v5957_v47  ;;  %v5489_v11 = vld [vmem:[#allocation4 + $0x64] ss:$16 sps:$4 sm:$0xff]  }
 0x3f5   :  { %1888 = vmatprep.subr.bf16.mxu0 %v1878_v28  ;;  %1929 = vmatprep.subr.bf16.mxu1 %v1884_v29  ;;  %v2257_v28 = vrot.slane %v5990_v33, 6  ;;  %v2434_v29 = vand.u32 %v4879_v22, %v5957_v47  ;;  %v5439_v22 = vld [vmem:[#allocation2 + $0x360] ss:$16 sps:$4 sm:$0xff]  }
 0x3f6   :  { %1918 = vmatprep.mubr.bf16.mxu0 %v5774_v54  ;;  %1959 = vmatprep.mubr.bf16.mxu1 %v5774_v54  ;;  %v2440_v30 = vand.u32 %v4881_v23, %v5957_v47  ;;  %v5442_v23 = vld [vmem:[#allocation2 + $0x368] ss:$16 sps:$4 sm:$0xff]  }
 0x3f8   :  { %1889 = vmatpush1.bf16.msra.mxu0 %v1875_v32  ;;  %1930 = vmatpush1.bf16.msra.mxu1 %v1881_v34  ;;  %v2534_v32 = vld [vmem:[#allocation2 + $0x2f8] sm:$0x77]  ;;  %v2431_v34 = vand.u32 %v4878_v26, %v5957_v47  ;;  %v2812_v26 = vshrl.u32 %v6123_v7, 16 }
 0x3f9   :  { %2025 = vmatprep.subr.bf16.mxu0 %v5371_v35  ;;  %2066 = vmatprep.subr.bf16.mxu1 %v5374_v36  ;;  %v2437_v35 = vand.u32 %v4880_v27, %v5957_v47  ;;  %v5411_v36 = vld [vmem:[#allocation2 + $0x2d4] ss:$16 sps:$4 sm:$0xff]  }
 0x3fb   :  { %4842 = vmatmul.mubr.msk.bf16.vlgmr.msra.gmra.mrb[52].mxu0 %vm191_vm3, %v1840_v43  ;;  %4843 = vmatmul.mubr.msk.bf16.vlgmr.msra.gmra.mrb[52].mxu1 %vm191_vm3, %v1840_v43  ;;  %v4890_v43 = vcombine.low %v2534_v32, %v2534_v32 }
 0x3fc   :  { %2026 = vmatpush1.bf16.msra.mxu0 %v5369_v39  ;;  %2067 = vmatpush1.bf16.msra.mxu1 %v5372_v40  ;;  %v4891_v39 = vcombine.high %v2534_v32, %v2534_v32  ;;  %v5409_v40 = vld [vmem:[#allocation2 + $0x2d0] ss:$16 sps:$4 sm:$0xff]  }
 0x3fd   :  { %2027 = vmatprep.subr.bf16.mxu0 %v2017_v44  ;;  %2068 = vmatprep.subr.bf16.mxu1 %v2023_v45  ;;  %v2396_v44 = vrot.slane %v5968_v4, 7  ;;  %v2573_v45 = vand.u32 %v4889_v38, %v5957_v47  ;;  %v5421_v4 = vld [vmem:[#allocation2 + $0x304] ss:$16 sps:$4 sm:$0xff]   ;;  %v5449_v38 = vld [vmem:[#allocation2 + $0x390] ss:$16 sps:$4 sm:$0xff]  }
 0x3fe   :  { %2057 = vmatprep.mubr.bf16.mxu0 %v5774_v54  ;;  %2098 = vmatprep.mubr.bf16.mxu1 %v5774_v54  ;;  %v2579_v46 = vand.u32 %v4891_v39, %v5957_v47  ;;  %v5452_v39 = vld [vmem:[#allocation2 + $0x398] ss:$16 sps:$4 sm:$0xff]  }
 0x400   :  { %2028 = vmatpush1.bf16.msra.mxu0 %v2014_v49  ;;  %2069 = vmatpush1.bf16.msra.mxu1 %v2020_v50  ;;  %v2673_v49 = vld [vmem:[#allocation2 + $0x328] sm:$0x77]  ;;  %v2570_v50 = vand.u32 %v4888_v42, %v5957_v47  ;;  %v2953_v42 = vrot.slane %v6123_v7, 1 }
 0x401   :  { %2164 = vmatprep.subr.bf16.mxu0 %v5381_v51  ;;  %2205 = vmatprep.subr.bf16.mxu1 %v5384_v52  ;;  %v2576_v51 = vand.u32 %v4890_v43, %v5957_v47  ;;  %v5424_v52 = vld [vmem:[#allocation2 + $0x30c] ss:$16 sps:$4 sm:$0xff]   ;;  %v4901_v55 = vcombine.high %v2673_v49, %v2673_v49  ;;  %v4900_v59 = vcombine.low %v2673_v49, %v2673_v49 }
 0x403   :  { %4852 = vmatmul.mubr.msk.bf16.vlgmr.msra.gmra.mrb[56].mxu0 %vm191_vm3, %v1979_v60  ;;  %4853 = vmatmul.mubr.msk.bf16.vlgmr.msra.gmra.mrb[56].mxu1 %vm191_vm3, %v1979_v60  ;;  %v2535_v60 = vrot.slane %v5990_v33, 7  ;;  %v5431_v33 = vld [vmem:[#allocation2 + $0x334] ss:$16 sps:$4 sm:$0xff]  }
 0x404   :  { %2165 = vmatpush1.bf16.msra.mxu0 %v5379_v56  ;;  %2206 = vmatpush1.bf16.msra.mxu1 %v5382_v57  ;;  %v5419_v56 = vld [vmem:[#allocation2 + $0x300] ss:$16 sps:$4 sm:$0xff]   ;;  %v5422_v57 = vld [vmem:[#allocation2 + $0x308] ss:$16 sps:$4 sm:$0xff]  }
 0x405   :  { %2166 = vmatprep.subr.bf16.mxu0 %v2156_v61  ;;  %2207 = vmatprep.subr.bf16.mxu1 %v2162_v62  ;;  %v2711_v61 = vand.u32 %v4899_v53, %v5957_v47  ;;  %v2717_v62 = vand.u32 %v4901_v55, %v5957_v47  ;;  %v5459_v53 = vld [vmem:[#allocation2 + $0x3c0] ss:$16 sps:$4 sm:$0xff]   ;;  %v5462_v55 = vld [vmem:[#allocation2 + $0x3c8] ss:$16 sps:$4 sm:$0xff]  }
 0x406   :  { %2196 = vmatprep.mubr.bf16.mxu0 %v5774_v54  ;;  %2237 = vmatprep.mubr.bf16.mxu1 %v5774_v54 }
 0x408   :  { %2167 = vmatpush1.bf16.msra.mxu0 %v2153_v1  ;;  %2208 = vmatpush1.bf16.msra.mxu1 %v2159_v2  ;;  %v2708_v1 = vand.u32 %v4898_v58, %v5957_v47  ;;  %v2714_v2 = vand.u32 %v4900_v59, %v5957_v47  ;;  %v3092_v58 = vrot.slane %v2812_v26, 1 }
 0x409   :  { %2303 = vmatprep.subr.bf16.mxu0 %v5391_v3  ;;  %2344 = vmatprep.subr.bf16.mxu1 %v5394_v5  ;;  %v5434_v3 = vld [vmem:[#allocation2 + $0x33c] ss:$16 sps:$4 sm:$0xff]   ;;  %v4909_v5 = vcombine.high %v2810_v63, %v2810_v63  ;;  %v3231_v63 = vrot.slane %v6123_v7, 2 }
 0x40b   :  { %4862 = vmatmul.mubr.msk.bf16.vlgmr.msra.gmra.mrb[60].mxu0 %vm191_vm3, %v2118_v12  ;;  %4863 = vmatmul.mubr.msk.bf16.vlgmr.msra.gmra.mrb[60].mxu1 %vm191_vm3, %v2118_v12  ;;  %v2851_v12 = vand.u32 %v4909_v5, %v5957_v47  ;;  %v5478_v5 = vld [vmem:[#allocation4 + $0x28] ss:$16 sps:$4 sm:$0xff]  }
 0x40c   :  { %2304 = vmatpush1.bf16.msra.mxu0 %v5389_v8  ;;  %2345 = vmatpush1.bf16.msra.mxu1 %v5392_v9  ;;  %v5429_v8 = vld [vmem:[#allocation2 + $0x330] ss:$16 sps:$4 sm:$0xff]   ;;  %v5432_v9 = vld [vmem:[#allocation2 + $0x338] ss:$16 sps:$4 sm:$0xff]  }
 0x40d   :  { %2305 = vmatprep.subr.bf16.mxu0 %v2295_v13  ;;  %2346 = vmatprep.subr.bf16.mxu1 %v2301_v14  ;;  %v2857_v13 = vand.u32 %v4911_v6, %v5957_v47  ;;  %v2950_v14 = vld [vmem:[#allocation2 + $0x380] sm:$0x77] }
 0x40e   :  { %2335 = vmatprep.mubr.bf16.mxu0 %v5774_v54  ;;  %2376 = vmatprep.mubr.bf16.mxu1 %v5774_v54  ;;  %v5483_v6 = vld [vmem:[#allocation4 + $0x44] ss:$16 sps:$4 sm:$0xff]  }
 0x410   :  { %2306 = vmatpush1.bf16.msra.mxu0 %v2292_v17  ;;  %2347 = vmatpush1.bf16.msra.mxu1 %v2298_v19  ;;  %v5441_v17 = vld [vmem:[#allocation2 + $0x364] ss:$16 sps:$4 sm:$0xff]   ;;  %v5444_v19 = vld [vmem:[#allocation2 + $0x36c] ss:$16 sps:$4 sm:$0xff]  }
 0x411   :  { %2442 = vmatprep.subr.bf16.mxu0 %v5401_v20  ;;  %2483 = vmatprep.subr.bf16.mxu1 %v5404_v21  ;;  %v4919_v20 = vcombine.high %v2950_v14, %v2950_v14  ;;  %v4921_v21 = vcombine.high %v2951_v15, %v2951_v15 }
 0x413   :  { %4872 = vmatmul.mubr.msk.bf16.vlgmr.msra.gmra.mrb[64].mxu0 %vm191_vm3, %v2257_v28  ;;  %4873 = vmatmul.mubr.msk.bf16.vlgmr.msra.gmra.mrb[64].mxu1 %vm191_vm3, %v2257_v28  ;;  %v2991_v27 = vand.u32 %v4919_v20, %v5957_v47  ;;  %v2997_v28 = vand.u32 %v4921_v21, %v5957_v47 }
 0x414   :  { %2443 = vmatpush1.bf16.msra.mxu0 %v5399_v24  ;;  %2484 = vmatpush1.bf16.msra.mxu1 %v5402_v25  ;;  %v4918_v24 = vcombine.low %v2950_v14, %v2950_v14  ;;  %v4920_v25 = vcombine.low %v2951_v15, %v2951_v15  ;;  %v5495_v14 = vld [vmem:[#allocation4 + $0x84] ss:$16 sps:$4 sm:$0xff]   ;;  %v5498_v15 = vld [vmem:[#allocation4 + $0x8c] ss:$16 sps:$4 sm:$0xff]  }
 0x415   :  { %2444 = vmatprep.subr.bf16.mxu0 %v2434_v29  ;;  %2485 = vmatprep.subr.bf16.mxu1 %v2440_v30  ;;  %v3090_v29 = vld [vmem:[#allocation2 + $0x3b0] sm:$0x77]  ;;  %v3091_v30 = vld [vmem:[#allocation2 + $0x3b8] sm:$0x77] }
 0x416   :  { %2474 = vmatprep.mubr.bf16.mxu0 %v5774_v54  ;;  %2515 = vmatprep.mubr.bf16.mxu1 %v5774_v54  ;;  %v2988_v31 = vand.u32 %v4918_v24, %v5957_v47  ;;  %v2994_v32 = vand.u32 %v4920_v25, %v5957_v47  ;;  %v5499_v24 = vld [vmem:[#allocation4 + $0xa0] ss:$16 sps:$4 sm:$0xff]   ;;  %v5501_v25 = vld [vmem:[#allocation4 + $0xa4] ss:$16 sps:$4 sm:$0xff]  }
 0x418   :  { %2445 = vmatpush1.bf16.msra.mxu0 %v2431_v34  ;;  %2486 = vmatpush1.bf16.msra.mxu1 %v2437_v35  ;;  %v5451_v34 = vld [vmem:[#allocation2 + $0x394] ss:$16 sps:$4 sm:$0xff]   ;;  %v5454_v35 = vld [vmem:[#allocation2 + $0x39c] ss:$16 sps:$4 sm:$0xff]  }
 0x419   :  { %2581 = vmatprep.subr.bf16.mxu0 %v5411_v36  ;;  %2622 = vmatprep.subr.bf16.mxu1 %v5414_v37  ;;  %v4929_v36 = vcombine.high %v3090_v29, %v3090_v29  ;;  %v4931_v37 = vcombine.high %v3091_v30, %v3091_v30 }
 0x41b   :  { %4882 = vmatmul.mubr.msk.bf16.vlgmr.msra.gmra.mrb[68].mxu0 %vm191_vm3, %v2396_v44  ;;  %4883 = vmatmul.mubr.msk.bf16.vlgmr.msra.gmra.mrb[68].mxu1 %vm191_vm3, %v2396_v44  ;;  %v3130_v43 = vand.u32 %v4929_v36, %v5957_v47  ;;  %v3136_v44 = vand.u32 %v4931_v37, %v5957_v47  ;;  %v5508_v36 = vld [vmem:[#allocation4 + $0xc8] ss:$16 sps:$4 sm:$0xff]  }
 0x41c   :  { %2582 = vmatpush1.bf16.msra.mxu0 %v5409_v40  ;;  %2623 = vmatpush1.bf16.msra.mxu1 %v5412_v41  ;;  %v4928_v40 = vcombine.low %v3090_v29, %v3090_v29  ;;  %v4930_v41 = vcombine.low %v3091_v30, %v3091_v30  ;;  %v5504_v29 = vld [vmem:[#allocation4 + $0xac] ss:$16 sps:$4 sm:$0xff]   ;;  %v5507_v30 = vld [vmem:[#allocation4 + $0xc4] ss:$16 sps:$4 sm:$0xff]  }
 0x41d   :  { %2583 = vmatprep.subr.bf16.mxu0 %v2573_v45  ;;  %2624 = vmatprep.subr.bf16.mxu1 %v2579_v46  ;;  %v3229_v45 = vld [vmem:[#allocation2 + $0x3e0] sm:$0x77]  ;;  %v3230_v46 = vld [vmem:[#allocation2 + $0x3e8] sm:$0x77] }
 0x41e   :  { %2613 = vmatprep.mubr.bf16.mxu0 %v5774_v54  ;;  %2654 = vmatprep.mubr.bf16.mxu1 %v5774_v54  ;;  %v3127_v48 = vand.u32 %v4928_v40, %v5957_v47  ;;  %v3133_v49 = vand.u32 %v4930_v41, %v5957_v47 }
 0x420   :  { %2584 = vmatpush1.bf16.msra.mxu0 %v2570_v50  ;;  %2625 = vmatpush1.bf16.msra.mxu1 %v2576_v51  ;;  %v5461_v50 = vld [vmem:[#allocation2 + $0x3c4] ss:$16 sps:$4 sm:$0xff]   ;;  %v5464_v51 = vld [vmem:[#allocation2 + $0x3cc] ss:$16 sps:$4 sm:$0xff]  }
 0x421   :  { %2719 = vmatprep.subr.bf16.mxu0 %v5421_v4  ;;  %2760 = vmatprep.subr.bf16.mxu1 %v5424_v52  ;;  %v4939_v4 = vcombine.high %v3229_v45, %v3229_v45  ;;  %v4941_v52 = vcombine.high %v3230_v46, %v3230_v46 }
 0x423   :  { %4892 = vmatmul.mubr.msk.bf16.vlgmr.msra.gmra.mrb[72].mxu0 %vm191_vm3, %v2535_v60  ;;  %4893 = vmatmul.mubr.msk.bf16.vlgmr.msra.gmra.mrb[72].mxu1 %vm191_vm3, %v2535_v60  ;;  %v3269_v59 = vand.u32 %v4939_v4, %v5957_v47  ;;  %v3275_v60 = vand.u32 %v4941_v52, %v5957_v47  ;;  %v5519_v4 = vld [vmem:[#allocation4 + $0x104] ss:$16 sps:$4 sm:$0xff]   ;;  %v5522_v52 = vld [vmem:[#allocation4 + $0x10c] ss:$16 sps:$4 sm:$0xff]  }
 0x424   :  { %2720 = vmatpush1.bf16.msra.mxu0 %v5419_v56  ;;  %2761 = vmatpush1.bf16.msra.mxu1 %v5422_v57  ;;  %v4938_v56 = vcombine.low %v3229_v45, %v3229_v45  ;;  %v4940_v57 = vcombine.low %v3230_v46, %v3230_v46 }
 0x425   :  { %2721 = vmatprep.subr.bf16.mxu0 %v2711_v61  ;;  %2762 = vmatprep.subr.bf16.mxu1 %v2717_v62 }
 0x426   :  { %2751 = vmatprep.mubr.bf16.mxu0 %v5774_v54  ;;  %2792 = vmatprep.mubr.bf16.mxu1 %v5774_v54  ;;  %v3266_v61 = vand.u32 %v4938_v56, %v5957_v47  ;;  %v3272_v62 = vand.u32 %v4940_v57, %v5957_v47  ;;  %v5475_v47 = vld [vmem:[#allocation4 + $0x20] ss:$16 sps:$4 sm:$0xff]   ;;  %v5520_v57 = vld [vmem:[#allocation4 + $0x108] ss:$16 sps:$4 sm:$0xff]  }
 0x427   :  { %v5517_v56 = vld [vmem:[#allocation4 + $0x100] ss:$16 sps:$4 sm:$0xff]  }
 0x428   :  { %2722 = vmatpush1.bf16.msra.mxu0 %v2708_v1  ;;  %2763 = vmatpush1.bf16.msra.mxu1 %v2714_v2  ;;  %v5474_v1 = vld [vmem:[#allocation4 + $0xc] ss:$16 sps:$4 sm:$0xff]   ;;  %v5469_v2 = vld [vmem:[#allocation4] ss:$16 sps:$4 sm:$0xff]  }
 0x429   :  { %2859 = vmatprep.subr.bf16.mxu0 %v5431_v33  ;;  %2900 = vmatprep.subr.bf16.mxu1 %v5434_v3  ;;  %v5472_v33 = vld [vmem:[#allocation4 + $0x8] ss:$16 sps:$4 sm:$0xff]   ;;  %v5477_v3 = vld [vmem:[#allocation4 + $0x24] ss:$16 sps:$4 sm:$0xff]  }
 0x42b   :  { %4902 = vmatmul.mubr.msk.bf16.vlgmr.msra.gmra.mrb[76].mxu0 %vm191_vm3, %v6123_v7  ;;  %4903 = vmatmul.mubr.msk.bf16.vlgmr.msra.gmra.mrb[76].mxu1 %vm191_vm3, %v6123_v7  ;;  %v5486_v7 = vld [vmem:[#allocation4 + $0x4c] ss:$16 sps:$4 sm:$0xff]  }
 0x42c   :  { %2860 = vmatpush1.bf16.msra.mxu0 %v5429_v8  ;;  %2901 = vmatpush1.bf16.msra.mxu1 %v5432_v9  ;;  %v5481_v8 = vld [vmem:[#allocation4 + $0x40] ss:$16 sps:$4 sm:$0xff]   ;;  %v5484_v9 = vld [vmem:[#allocation4 + $0x48] ss:$16 sps:$4 sm:$0xff]  }
 0x42d   :  { %2861 = vmatprep.subr.bf16.mxu0 %v2851_v12  ;;  %2902 = vmatprep.subr.bf16.mxu1 %v2857_v13  ;;  %v5490_v12 = vld [vmem:[#allocation4 + $0x68] ss:$16 sps:$4 sm:$0xff]   ;;  %v5492_v13 = vld [vmem:[#allocation4 + $0x6c] ss:$16 sps:$4 sm:$0xff]  }
 0x42e   :  { %2891 = vmatprep.mubr.bf16.mxu0 %v5774_v54  ;;  %2932 = vmatprep.mubr.bf16.mxu1 %v5774_v54 }
 0x430   :  { %2862 = vmatpush1.bf16.msra.mxu0 %v2848_v18  ;;  %2903 = vmatpush1.bf16.msra.mxu1 %v2854_v16 }
 0x431   :  { %2999 = vmatprep.subr.bf16.mxu0 %v5441_v17  ;;  %3040 = vmatprep.subr.bf16.mxu1 %v5444_v19  ;;  %v5493_v17 = vld [vmem:[#allocation4 + $0x80] ss:$16 sps:$4 sm:$0xff]   ;;  %v5496_v19 = vld [vmem:[#allocation4 + $0x88] ss:$16 sps:$4 sm:$0xff]  }
 0x433   :  { %4912 = vmatmul.mubr.msk.bf16.vlgmr.msra.gmra.mrb[80].mxu0 %vm191_vm3, %v2812_v26  ;;  %4913 = vmatmul.mubr.msk.bf16.vlgmr.msra.gmra.mrb[80].mxu1 %vm191_vm3, %v2812_v26 }
 0x434   :  { %3000 = vmatpush1.bf16.msra.mxu0 %v5439_v22  ;;  %3041 = vmatpush1.bf16.msra.mxu1 %v5442_v23 }
 0x435   :  { %3001 = vmatprep.subr.bf16.mxu0 %v2991_v27  ;;  %3042 = vmatprep.subr.bf16.mxu1 %v2997_v28  ;;  %v5502_v28 = vld [vmem:[#allocation4 + $0xa8] ss:$16 sps:$4 sm:$0xff]  }
 0x436   :  { %3031 = vmatprep.mubr.bf16.mxu0 %v5774_v54  ;;  %3072 = vmatprep.mubr.bf16.mxu1 %v5774_v54 }
 0x438   :  { %3002 = vmatpush1.bf16.msra.mxu0 %v2988_v31  ;;  %3043 = vmatpush1.bf16.msra.mxu1 %v2994_v32  ;;  %v5510_v31 = vld [vmem:[#allocation4 + $0xcc] ss:$16 sps:$4 sm:$0xff]  }
 0x439   :  { %3138 = vmatprep.subr.bf16.mxu0 %v5451_v34  ;;  %3179 = vmatprep.subr.bf16.mxu1 %v5454_v35  ;;  %v5505_v35 = vld [vmem:[#allocation4 + $0xc0] ss:$16 sps:$4 sm:$0xff]  }
 0x43b   :  { %4922 = vmatmul.mubr.msk.bf16.vlgmr.msra.gmra.mrb[84].mxu0 %vm191_vm3, %v2953_v42  ;;  %4923 = vmatmul.mubr.msk.bf16.vlgmr.msra.gmra.mrb[84].mxu1 %vm191_vm3, %v2953_v42 }
 0x43c   :  { %3139 = vmatpush1.bf16.msra.mxu0 %v5449_v38  ;;  %3180 = vmatpush1.bf16.msra.mxu1 %v5452_v39 }
 0x43d   :  { %3140 = vmatprep.subr.bf16.mxu0 %v3130_v43  ;;  %3181 = vmatprep.subr.bf16.mxu1 %v3136_v44 }
 0x43e   :  { %3170 = vmatprep.mubr.bf16.mxu0 %v5774_v54  ;;  %3211 = vmatprep.mubr.bf16.mxu1 %v5774_v54 }
 0x440   :  { %3141 = vmatpush1.bf16.msra.mxu0 %v3127_v48  ;;  %3182 = vmatpush1.bf16.msra.mxu1 %v3133_v49  ;;  %v5511_v48 = vld [vmem:[#allocation4 + $0xe0] ss:$16 sps:$4 sm:$0xff]   ;;  %v5513_v49 = vld [vmem:[#allocation4 + $0xe4] ss:$16 sps:$4 sm:$0xff]  }
 0x441   :  { %3277 = vmatprep.subr.bf16.mxu0 %v5461_v50  ;;  %3318 = vmatprep.subr.bf16.mxu1 %v5464_v51  ;;  %v5514_v50 = vld [vmem:[#allocation4 + $0xe8] ss:$16 sps:$4 sm:$0xff]   ;;  %v5516_v51 = vld [vmem:[#allocation4 + $0xec] ss:$16 sps:$4 sm:$0xff]  }
 0x443   :  { %4932 = vmatmul.mubr.msk.bf16.vlgmr.msra.gmra.mrb[88].mxu0 %vm191_vm3, %v3092_v58  ;;  %4933 = vmatmul.mubr.msk.bf16.vlgmr.msra.gmra.mrb[88].mxu1 %vm191_vm3, %v3092_v58 }
 0x444   :  { %3278 = vmatpush1.bf16.msra.mxu0 %v5459_v53  ;;  %3319 = vmatpush1.bf16.msra.mxu1 %v5462_v55 }
 0x445   :  { %3279 = vmatprep.subr.bf16.mxu0 %v3269_v59  ;;  %3320 = vmatprep.subr.bf16.mxu1 %v3275_v60 }
 0x446   :  { %3309 = vmatprep.mubr.bf16.mxu0 %v5774_v54  ;;  %3350 = vmatprep.mubr.bf16.mxu1 %v5774_v54  ;;  %v5480_v54 = vld [vmem:[#allocation4 + $0x2c] ss:$16 sps:$4 sm:$0xff]  }
 0x448   :  { %3280 = vmatpush1.bf16.msra.mxu0 %v3266_v61  ;;  %3321 = vmatpush1.bf16.msra.mxu1 %v3272_v62 }
 0x449   :  { %4199 = vmatprep.subr.bf16.mxu0 %v5471_v0  ;;  %4281 = vmatprep.subr.bf16.mxu1 %v5474_v1  ;;  %v5523_v0 = vld [vmem:[#allocation4 + $0x120] ss:$16 sps:$4 sm:$0xff]   ;;  %v5525_v1 = vld [vmem:[#allocation4 + $0x124] ss:$16 sps:$4 sm:$0xff]  }
 0x44b   :  { %4942 = vmatmul.mubr.msk.bf16.vlgmr.msra.gmra.mrb[92].mxu0 %vm191_vm3, %v3231_v63  ;;  %4943 = vmatmul.mubr.msk.bf16.vlgmr.msra.gmra.mrb[92].mxu1 %vm191_vm3, %v3231_v63 }
 0x44c   :  { %4200 = vmatpush1.bf16.msra.mxu0 %v5469_v2  ;;  %4282 = vmatpush1.bf16.msra.mxu1 %v5472_v33  ;;  %v5526_v2 = vld [vmem:[#allocation4 + $0x128] ss:$16 sps:$4 sm:$0xff]   ;;  %v5528_v33 = vld [vmem:[#allocation4 + $0x12c] ss:$16 sps:$4 sm:$0xff]  }
 0x44d   :  { %4201 = vmatprep.subr.bf16.mxu0 %v5477_v3  ;;  %4283 = vmatprep.subr.bf16.mxu1 %v5480_v54  ;;  %v5534_v3 = vld [vmem:[#allocation4 + $0x14c] ss:$16 sps:$4 sm:$0xff]  }
 0x450   :  { %4202 = vmatpush1.bf16.msra.mxu0 %v5475_v47  ;;  %4284 = vmatpush1.bf16.msra.mxu1 %v5478_v5  ;;  %v5531_v47 = vld [vmem:[#allocation4 + $0x144] ss:$16 sps:$4 sm:$0xff]  }
 0x451   :  { %4203 = vmatprep.subr.bf16.mxu0 %v5483_v6  ;;  %4285 = vmatprep.subr.bf16.mxu1 %v5486_v7  ;;  %v5529_v6 = vld [vmem:[#allocation4 + $0x140] ss:$16 sps:$4 sm:$0xff]   ;;  %v5532_v7 = vld [vmem:[#allocation4 + $0x148] ss:$16 sps:$4 sm:$0xff]  }
 0x454   :  { %4204 = vmatpush1.bf16.msra.mxu0 %v5481_v8  ;;  %4286 = vmatpush1.bf16.msra.mxu1 %v5484_v9 }
 0x455   :  { %4205 = vmatprep.subr.bf16.mxu0 %v5489_v11  ;;  %4287 = vmatprep.subr.bf16.mxu1 %v5492_v13 }
 0x458   :  { %4206 = vmatpush1.bf16.msra.mxu0 %v5487_v10  ;;  %4288 = vmatpush1.bf16.msra.mxu1 %v5490_v12 }
 0x459   :  { %4207 = vmatprep.subr.bf16.mxu0 %v5495_v14  ;;  %4289 = vmatprep.subr.bf16.mxu1 %v5498_v15 }
 0x45c   :  { %4208 = vmatpush1.bf16.msra.mxu0 %v5493_v17  ;;  %4290 = vmatpush1.bf16.msra.mxu1 %v5496_v19  ;;  %v5535_v17 = vld [vmem:[#allocation4 + $0x160] ss:$16 sps:$4 sm:$0xff]   ;;  %v5537_v19 = vld [vmem:[#allocation4 + $0x164] ss:$16 sps:$4 sm:$0xff]  }
 0x45d   :  { %4209 = vmatprep.subr.bf16.mxu0 %v5501_v25  ;;  %4291 = vmatprep.subr.bf16.mxu1 %v5504_v29 }
 0x460   :  { %4210 = vmatpush1.bf16.msra.mxu0 %v5499_v24  ;;  %4292 = vmatpush1.bf16.msra.mxu1 %v5502_v28 }
 0x461   :  { %4211 = vmatprep.subr.bf16.mxu0 %v5507_v30  ;;  %4293 = vmatprep.subr.bf16.mxu1 %v5510_v31 }
 0x464   :  { %4212 = vmatpush1.bf16.msra.mxu0 %v5505_v35  ;;  %4294 = vmatpush1.bf16.msra.mxu1 %v5508_v36  ;;  %v5549_v35 = vld [vmem:[#allocation4 + $0x1a4] ss:$16 sps:$4 sm:$0xff]   ;;  %v5552_v36 = vld [vmem:[#allocation4 + $0x1ac] ss:$16 sps:$4 sm:$0xff]  }
 0x465   :  { %4213 = vmatprep.subr.bf16.mxu0 %v5513_v49  ;;  %4295 = vmatprep.subr.bf16.mxu1 %v5516_v51  ;;  %v5556_v49 = vld [vmem:[#allocation4 + $0x1c8] ss:$16 sps:$4 sm:$0xff]  }
 0x468   :  { %4214 = vmatpush1.bf16.msra.mxu0 %v5511_v48  ;;  %4296 = vmatpush1.bf16.msra.mxu1 %v5514_v50  ;;  %v5553_v48 = vld [vmem:[#allocation4 + $0x1c0] ss:$16 sps:$4 sm:$0xff]  }
 0x469   :  { %4215 = vmatprep.subr.bf16.mxu0 %v5519_v4  ;;  %4297 = vmatprep.subr.bf16.mxu1 %v5522_v52 }
 0x46c   :  { %4216 = vmatpush1.bf16.msra.mxu0 %v5517_v56  ;;  %4298 = vmatpush1.bf16.msra.mxu1 %v5520_v57 }
 0x46d   :  { %4217 = vmatprep.subr.bf16.mxu0 %v5525_v1  ;;  %4299 = vmatprep.subr.bf16.mxu1 %v5528_v33  ;;  %v5570_v1 = vld [vmem:[#allocation4 + $0x20c] ss:$16 sps:$4 sm:$0xff]  }
 0x470   :  { %4218 = vmatpush1.bf16.msra.mxu0 %v5523_v0  ;;  %4300 = vmatpush1.bf16.msra.mxu1 %v5526_v2  ;;  %v5567_v0 = vld [vmem:[#allocation4 + $0x204] ss:$16 sps:$4 sm:$0xff]  }
 0x471   :  { %4219 = vmatprep.subr.bf16.mxu0 %v5531_v47  ;;  %4301 = vmatprep.subr.bf16.mxu1 %v5534_v3 }
 0x474   :  { %4220 = vmatpush1.bf16.msra.mxu0 %v5529_v6  ;;  %4302 = vmatpush1.bf16.msra.mxu1 %v5532_v7 }
 0x475   :  { %4221 = vmatprep.subr.bf16.mxu0 %v5537_v19 }
 0x478   :  { %4222 = vmatpush1.bf16.msra.mxu0 %v5535_v17 }
 0x47e   :  { %v590_v18 = vpop.f32.mrb[12].mxu0  ;;  %v631_v16 = vpop.f32.mrb[12].mxu1 }
 0x47f   :  { %v592_v20 = vpop.f32.mrb[13].mxu0  ;;  %v633_v21 = vpop.f32.mrb[13].mxu1 }
 0x480   :  { %v594_v22 = vpop.f32.mrb[14].mxu0  ;;  %v635_v23 = vpop.f32.mrb[14].mxu1 }
 0x481   :  { %v595_v26 = vpop.f32.mrb[15].mxu0  ;;  %v636_v27 = vpop.f32.mrb[15].mxu1  ;;  %v5543_v22 = vld [vmem:[#allocation4 + $0x184] ss:$16 sps:$4 sm:$0xff]   ;;  %v5546_v23 = vld [vmem:[#allocation4 + $0x18c] ss:$16 sps:$4 sm:$0xff]  }
 0x482   :  { %v5541_v26 = vld [vmem:[#allocation4 + $0x180] ss:$16 sps:$4 sm:$0xff]   ;;  %v5544_v27 = vld [vmem:[#allocation4 + $0x188] ss:$16 sps:$4 sm:$0xff]   ;;  %4223 = vmatprep.subr.bf16.mxu0 %v5543_v22 }
 0x483   :  { %4224 = vmatpush1.bf16.msra.mxu0 %v5541_v26 }
 0x484   :  { %4225 = vmatprep.subr.bf16.mxu0 %v5549_v35 }
 0x486   :  { %v717_v32 = vpop.f32.mrb[16].mxu0  ;;  %v758_v34 = vpop.f32.mrb[16].mxu1 }
 0x487   :  { %v6164_v37 = vadd.f32 %v717_v32, %v590_v18  ;;  %v6166_v38 = vadd.f32 %v758_v34, %v631_v16  ;;  %v719_v39 = vpop.f32.mrb[17].mxu0  ;;  %v760_v40 = vpop.f32.mrb[17].mxu1 }
 0x488   :  { %v6168_v41 = vadd.f32 %v719_v39, %v592_v20  ;;  %v6170_v42 = vadd.f32 %v760_v40, %v633_v21  ;;  %v721_v43 = vpop.f32.mrb[18].mxu0  ;;  %v762_v44 = vpop.f32.mrb[18].mxu1  ;;  %v5538_v20 = vld [vmem:[#allocation4 + $0x168] ss:$16 sps:$4 sm:$0xff]   ;;  %v5540_v21 = vld [vmem:[#allocation4 + $0x16c] ss:$16 sps:$4 sm:$0xff]  }
 0x489   :  { %v722_v45 = vpop.f32.mrb[19].mxu0  ;;  %v763_v46 = vpop.f32.mrb[19].mxu1  ;;  %4303 = vmatprep.subr.bf16.mxu1 %v5540_v21  ;;  %v5547_v39 = vld [vmem:[#allocation4 + $0x1a0] ss:$16 sps:$4 sm:$0xff]   ;;  %v5550_v40 = vld [vmem:[#allocation4 + $0x1a8] ss:$16 sps:$4 sm:$0xff]  }
 0x48a   :  { %4304 = vmatpush1.bf16.msra.mxu1 %v5538_v20  ;;  %4226 = vmatpush1.bf16.msra.mxu0 %v5547_v39  ;;  %v5555_v43 = vld [vmem:[#allocation4 + $0x1c4] ss:$16 sps:$4 sm:$0xff]   ;;  %v5558_v44 = vld [vmem:[#allocation4 + $0x1cc] ss:$16 sps:$4 sm:$0xff]  }
 0x48b   :  { %4305 = vmatprep.subr.bf16.mxu1 %v5546_v23  ;;  %4227 = vmatprep.subr.bf16.mxu0 %v5555_v43 }
 0x48e   :  { %v854_v53 = vpop.f32.mrb[20].mxu0  ;;  %v895_v55 = vpop.f32.mrb[20].mxu1  ;;  %4306 = vmatpush1.bf16.msra.mxu1 %v5544_v27  ;;  %4228 = vmatpush1.bf16.msra.mxu0 %v5553_v48 }
 0x48f   :  { %v856_v58 = vpop.f32.mrb[21].mxu0  ;;  %v897_v59 = vpop.f32.mrb[21].mxu1  ;;  %4307 = vmatprep.subr.bf16.mxu1 %v5552_v36 }
 0x490   :  { %v858_v60 = vpop.f32.mrb[22].mxu0  ;;  %v899_v61 = vpop.f32.mrb[22].mxu1 }
 0x491   :  { %v859_v62 = vpop.f32.mrb[23].mxu0  ;;  %v900_v63 = vpop.f32.mrb[23].mxu1  ;;  %v5564_v60 = vld [vmem:[#allocation4 + $0x1ec] ss:$16 sps:$4 sm:$0xff]  }
 0x492   :  { %4308 = vmatpush1.bf16.msra.mxu1 %v5550_v40  ;;  %v5562_v63 = vld [vmem:[#allocation4 + $0x1e8] ss:$16 sps:$4 sm:$0xff]  }
 0x493   :  { %4309 = vmatprep.subr.bf16.mxu1 %v5558_v44 }
 0x496   :  { %v981_v5 = vpop.f32.mrb[24].mxu0  ;;  %v1022_v54 = vpop.f32.mrb[24].mxu1  ;;  %4310 = vmatpush1.bf16.msra.mxu1 %v5556_v49 }
 0x497   :  { %v6172_v8 = vadd.f32 %v981_v5, %v854_v53  ;;  %v6174_v9 = vadd.f32 %v1022_v54, %v895_v55  ;;  %v983_v10 = vpop.f32.mrb[25].mxu0  ;;  %v1024_v11 = vpop.f32.mrb[25].mxu1  ;;  %v5561_v53 = vld [vmem:[#allocation4 + $0x1e4] ss:$16 sps:$4 sm:$0xff]   ;;  %4311 = vmatprep.subr.bf16.mxu1 %v5564_v60 }
 0x498   :  { %v6176_v12 = vadd.f32 %v983_v10, %v856_v58  ;;  %v6178_v13 = vadd.f32 %v1024_v11, %v897_v59  ;;  %v985_v14 = vpop.f32.mrb[26].mxu0  ;;  %v1026_v15 = vpop.f32.mrb[26].mxu1  ;;  %v5559_v59 = vld [vmem:[#allocation4 + $0x1e0] ss:$16 sps:$4 sm:$0xff]   ;;  %4229 = vmatprep.subr.bf16.mxu0 %v5561_v53 }
 0x499   :  { %v986_v18 = vpop.f32.mrb[27].mxu0  ;;  %v1027_v16 = vpop.f32.mrb[27].mxu1  ;;  %4230 = vmatpush1.bf16.msra.mxu0 %v5559_v59 }
 0x49a   :  { %4312 = vmatpush1.bf16.msra.mxu1 %v5562_v63  ;;  %4240 = vmatprep.subr.bf16.mxu0 %v5567_v0 }
 0x49b   :  { %4322 = vmatprep.subr.bf16.mxu1 %v5570_v1 }
 0x49e   :  { %v1116_v24 = vpop.f32.mrb[28].mxu0  ;;  %v1157_v25 = vpop.f32.mrb[28].mxu1 }
 0x49f   :  { %v1118_v28 = vpop.f32.mrb[29].mxu0  ;;  %v1159_v29 = vpop.f32.mrb[29].mxu1 }
 0x4a0   :  { %v1120_v30 = vpop.f32.mrb[30].mxu0  ;;  %v1161_v31 = vpop.f32.mrb[30].mxu1 }
 0x4a1   :  { %v1121_v32 = vpop.f32.mrb[31].mxu0  ;;  %v1162_v34 = vpop.f32.mrb[31].mxu1 }
 0x4a6   :  { %v1244_v45 = vpop.f32.mrb[32].mxu0  ;;  %v1285_v46 = vpop.f32.mrb[32].mxu1 }
 0x4a7   :  { %v6180_v50 = vadd.f32 %v1244_v45, %v1116_v24  ;;  %v6182_v51 = vadd.f32 %v1285_v46, %v1157_v25  ;;  %v1246_v4 = vpop.f32.mrb[33].mxu0  ;;  %v1287_v52 = vpop.f32.mrb[33].mxu1 }
 0x4a8   :  { %v6184_v55 = vadd.f32 %v1246_v4, %v1118_v28  ;;  %v6186_v56 = vadd.f32 %v1287_v52, %v1159_v29  ;;  %v1248_v57 = vpop.f32.mrb[34].mxu0  ;;  %v1289_v58 = vpop.f32.mrb[34].mxu1 }
 0x4a9   :  { %v1249_v61 = vpop.f32.mrb[35].mxu0  ;;  %v1290_v62 = vpop.f32.mrb[35].mxu1 }
 0x4ae   :  { %v1379_v2 = vpop.f32.mrb[36].mxu0  ;;  %v1420_v33 = vpop.f32.mrb[36].mxu1 }
 0x4af   :  { %v1381_v47 = vpop.f32.mrb[37].mxu0  ;;  %v1422_v3 = vpop.f32.mrb[37].mxu1 }
 0x4b0   :  { %v1383_v5 = vpop.f32.mrb[38].mxu0  ;;  %v1424_v54 = vpop.f32.mrb[38].mxu1 }
 0x4b1   :  { %v1384_v6 = vpop.f32.mrb[39].mxu0  ;;  %v1425_v7 = vpop.f32.mrb[39].mxu1 }
 0x4b6   :  { %v1507_v10 = vpop.f32.mrb[40].mxu0  ;;  %v1548_v11 = vpop.f32.mrb[40].mxu1 }
 0x4b7   :  { %v1508_v14 = vadd.f32 %v1507_v10, %v1379_v2  ;;  %v1549_v15 = vadd.f32 %v1548_v11, %v1420_v33  ;;  %v1509_v18 = vpop.f32.mrb[41].mxu0  ;;  %v1550_v16 = vpop.f32.mrb[41].mxu1 }
 0x4b8   :  { %v1510_v17 = vadd.f32 %v1509_v18, %v1381_v47  ;;  %v1551_v19 = vadd.f32 %v1550_v16, %v1422_v3  ;;  %v1511_v20 = vpop.f32.mrb[42].mxu0  ;;  %v1552_v21 = vpop.f32.mrb[42].mxu1 }
 0x4b9   :  { %v1512_v22 = vpop.f32.mrb[43].mxu0  ;;  %v1553_v23 = vpop.f32.mrb[43].mxu1 }
 0x4be   :  { %v1642_v24 = vpop.f32.mrb[44].mxu0  ;;  %v1683_v25 = vpop.f32.mrb[44].mxu1 }
 0x4bf   :  { %v1690_v26 = vadd.f32 %v1642_v24, %v6164_v37  ;;  %v1692_v27 = vadd.f32 %v1683_v25, %v6166_v38  ;;  %v1644_v28 = vpop.f32.mrb[45].mxu0  ;;  %v1685_v29 = vpop.f32.mrb[45].mxu1 }
 0x4c0   :  { %v1691_v30 = vadd.f32 %v1644_v28, %v6168_v41  ;;  %v1693_v31 = vadd.f32 %v1685_v29, %v6170_v42  ;;  %v1646_v32 = vpop.f32.mrb[46].mxu0  ;;  %v1687_v34 = vpop.f32.mrb[46].mxu1 }
 0x4c1   :  { %v1647_v35 = vpop.f32.mrb[47].mxu0  ;;  %v1688_v36 = vpop.f32.mrb[47].mxu1 }
 0x4c6   :  { %v1781_v39 = vpop.f32.mrb[48].mxu0  ;;  %v1822_v40 = vpop.f32.mrb[48].mxu1 }
 0x4c7   :  { %v1829_v43 = vadd.f32 %v1781_v39, %v6172_v8  ;;  %v1831_v44 = vadd.f32 %v1822_v40, %v6174_v9  ;;  %v1783_v45 = vpop.f32.mrb[49].mxu0  ;;  %v1824_v37 = vpop.f32.mrb[49].mxu1 }
 0x4c8   :  { %v1830_v38 = vadd.f32 %v1783_v45, %v6176_v12  ;;  %v1832_v46 = vadd.f32 %v1824_v37, %v6178_v13  ;;  %v1785_v48 = vpop.f32.mrb[50].mxu0  ;;  %v1826_v41 = vpop.f32.mrb[50].mxu1 }
 0x4c9   :  { %v1786_v49 = vpop.f32.mrb[51].mxu0  ;;  %v1827_v42 = vpop.f32.mrb[51].mxu1 }
 0x4ce   :  { %v1920_v4 = vpop.f32.mrb[52].mxu0  ;;  %v1961_v52 = vpop.f32.mrb[52].mxu1 }
 0x4cf   :  { %v1968_v53 = vadd.f32 %v1920_v4, %v6180_v50  ;;  %v1970_v57 = vadd.f32 %v1961_v52, %v6182_v51  ;;  %v1922_v58 = vpop.f32.mrb[53].mxu0  ;;  %v1963_v8 = vpop.f32.mrb[53].mxu1 }
 0x4d0   :  { %v1969_v9 = vadd.f32 %v1922_v58, %v6184_v55  ;;  %v1971_v59 = vadd.f32 %v1963_v8, %v6186_v56  ;;  %v1924_v60 = vpop.f32.mrb[54].mxu0  ;;  %v1965_v12 = vpop.f32.mrb[54].mxu1 }
 0x4d1   :  { %v1925_v61 = vpop.f32.mrb[55].mxu0  ;;  %v1966_v13 = vpop.f32.mrb[55].mxu1 }
 0x4d6   :  { %v2059_v62 = vpop.f32.mrb[56].mxu0  ;;  %v2100_v63 = vpop.f32.mrb[56].mxu1 }
 0x4d7   :  { %v2107_v0 = vadd.f32 %v2059_v62, %v1508_v14  ;;  %v2109_v1 = vadd.f32 %v2100_v63, %v1549_v15  ;;  %v2061_v2 = vpop.f32.mrb[57].mxu0  ;;  %v2102_v33 = vpop.f32.mrb[57].mxu1 }
 0x4d8   :  { %v2108_v47 = vadd.f32 %v2061_v2, %v1510_v17  ;;  %v2110_v50 = vadd.f32 %v2102_v33, %v1551_v19  ;;  %v2063_v3 = vpop.f32.mrb[58].mxu0  ;;  %v2104_v51 = vpop.f32.mrb[58].mxu1 }
 0x4d9   :  { %v2064_v5 = vpop.f32.mrb[59].mxu0  ;;  %v2105_v54 = vpop.f32.mrb[59].mxu1 }
 0x4de   :  { %v2198_v6 = vpop.f32.mrb[60].mxu0  ;;  %v2239_v55 = vpop.f32.mrb[60].mxu1 }
 0x4df   :  { %v2246_v7 = vadd.f32 %v2198_v6, %v1690_v26  ;;  %v2248_v56 = vadd.f32 %v2239_v55, %v1692_v27  ;;  %v2200_v10 = vpop.f32.mrb[61].mxu0  ;;  %v2241_v11 = vpop.f32.mrb[61].mxu1 }
 0x4e0   :  { %v2247_v18 = vadd.f32 %v2200_v10, %v1691_v30  ;;  %v2249_v16 = vadd.f32 %v2241_v11, %v1693_v31  ;;  %v2202_v20 = vpop.f32.mrb[62].mxu0  ;;  %v2243_v21 = vpop.f32.mrb[62].mxu1 }
 0x4e1   :  { %v2203_v14 = vpop.f32.mrb[63].mxu0  ;;  %v2244_v15 = vpop.f32.mrb[63].mxu1 }
 0x4e6   :  { %v2337_v22 = vpop.f32.mrb[64].mxu0  ;;  %v2378_v23 = vpop.f32.mrb[64].mxu1 }
 0x4e7   :  { %v2385_v17 = vadd.f32 %v2337_v22, %v1829_v43  ;;  %v2387_v19 = vadd.f32 %v2378_v23, %v1831_v44  ;;  %v2339_v24 = vpop.f32.mrb[65].mxu0  ;;  %v2380_v25 = vpop.f32.mrb[65].mxu1 }
 0x4e8   :  { %v2386_v28 = vadd.f32 %v2339_v24, %v1830_v38  ;;  %v2388_v29 = vadd.f32 %v2380_v25, %v1832_v46  ;;  %v2341_v32 = vpop.f32.mrb[66].mxu0  ;;  %v2382_v34 = vpop.f32.mrb[66].mxu1 }
 0x4e9   :  { %v2342_v26 = vpop.f32.mrb[67].mxu0  ;;  %v2383_v27 = vpop.f32.mrb[67].mxu1 }
 0x4ee   :  { %v2476_v35 = vpop.f32.mrb[68].mxu0  ;;  %v2517_v36 = vpop.f32.mrb[68].mxu1 }
 0x4ef   :  { %v2524_v30 = vadd.f32 %v2476_v35, %v1968_v53  ;;  %v2526_v31 = vadd.f32 %v2517_v36, %v1970_v57  ;;  %v2478_v39 = vpop.f32.mrb[69].mxu0  ;;  %v2519_v40 = vpop.f32.mrb[69].mxu1 }
 0x4f0   :  { %v2525_v45 = vadd.f32 %v2478_v39, %v1969_v9  ;;  %v2527_v37 = vadd.f32 %v2519_v40, %v1971_v59  ;;  %v2480_v48 = vpop.f32.mrb[70].mxu0  ;;  %v2521_v41 = vpop.f32.mrb[70].mxu1  ;;  %v3377_v39 = vlaneseq }
 0x4f1   :  { %v2481_v43 = vpop.f32.mrb[71].mxu0  ;;  %v2522_v44 = vpop.f32.mrb[71].mxu1 }
 0x4f2   :  { %v6200_v44 = vshrl.u32 %v3377_v39, 7  ;;  %v5586_v39 = vld [vmem:[#allocation4 + $0x268] ss:$16 sps:$4 sm:$0xff]  }
 0x4f6   :  { %v2615_v49 = vpop.f32.mrb[72].mxu0  ;;  %v2656_v42 = vpop.f32.mrb[72].mxu1 }
 0x4f7   :  { %v2663_v38 = vadd.f32 %v2615_v49, %v2107_v0  ;;  %v2665_v46 = vadd.f32 %v2656_v42, %v2109_v1  ;;  %v2617_v4 = vpop.f32.mrb[73].mxu0  ;;  %v2658_v52 = vpop.f32.mrb[73].mxu1 }
 0x4f8   :  { %v2664_v58 = vadd.f32 %v2617_v4, %v2108_v47  ;;  %v2666_v8 = vadd.f32 %v2658_v52, %v2110_v50  ;;  %v2619_v60 = vpop.f32.mrb[74].mxu0  ;;  %v2660_v12 = vpop.f32.mrb[74].mxu1 }
 0x4f9   :  { %v2620_v53 = vpop.f32.mrb[75].mxu0  ;;  %v2661_v57 = vpop.f32.mrb[75].mxu1 }
 0x4fa   :  { %v3375_v53 = vld [vmem:[%s6244_s7] sm:$0xf]  ;;  %v3383_v57 = vsub.s32 1, %v6200_v44 }
 0x4fe   :  { %v2753_v61 = vpop.f32.mrb[76].mxu0  ;;  %v2794_v13 = vpop.f32.mrb[76].mxu1 }
 0x4ff   :  { %v2801_v9 = vadd.f32 %v2753_v61, %v2246_v7  ;;  %v2803_v59 = vadd.f32 %v2794_v13, %v2248_v56  ;;  %v2755_v62 = vpop.f32.mrb[77].mxu0  ;;  %v2796_v63 = vpop.f32.mrb[77].mxu1  ;;  %v3391_v61 = vsub.s32 3, %v6200_v44 }
 0x500   :  { %v2802_v2 = vadd.f32 %v2755_v62, %v2247_v18  ;;  %v2804_v33 = vadd.f32 %v2796_v63, %v2249_v16  ;;  %v2757_v3 = vpop.f32.mrb[78].mxu0  ;;  %v2798_v51 = vpop.f32.mrb[78].mxu1 }
 0x501   :  { %v2758_v0 = vpop.f32.mrb[79].mxu0  ;;  %v2799_v1 = vpop.f32.mrb[79].mxu1 }
 0x506   :  { %v2893_v5 = vpop.f32.mrb[80].mxu0  ;;  %v2934_v54 = vpop.f32.mrb[80].mxu1 }
 0x507   :  { %v2941_v47 = vadd.f32 %v2893_v5, %v2385_v17  ;;  %v2943_v50 = vadd.f32 %v2934_v54, %v2387_v19  ;;  %v2895_v6 = vpop.f32.mrb[81].mxu0  ;;  %v2936_v55 = vpop.f32.mrb[81].mxu1  ;;  %v3384_v54 = vrot.slane %v3375_v53, %v3383_v57 }
 0x508   :  { %v2942_v10 = vadd.f32 %v2895_v6, %v2386_v28  ;;  %v2944_v11 = vadd.f32 %v2936_v55, %v2388_v29  ;;  %v2897_v20 = vpop.f32.mrb[82].mxu0  ;;  %v2938_v21 = vpop.f32.mrb[82].mxu1 }
 0x509   :  { %v2898_v7 = vpop.f32.mrb[83].mxu0  ;;  %v2939_v56 = vpop.f32.mrb[83].mxu1 }
 0x50e   :  { %v3033_v14 = vpop.f32.mrb[84].mxu0  ;;  %v3074_v15 = vpop.f32.mrb[84].mxu1 }
 0x50f   :  { %v3081_v18 = vadd.f32 %v3033_v14, %v2524_v30  ;;  %v3083_v16 = vadd.f32 %v3074_v15, %v2526_v31  ;;  %v3035_v22 = vpop.f32.mrb[85].mxu0  ;;  %v3076_v23 = vpop.f32.mrb[85].mxu1 }
 0x510   :  { %v3082_v24 = vadd.f32 %v3035_v22, %v2525_v45  ;;  %v3084_v25 = vadd.f32 %v3076_v23, %v2527_v37  ;;  %v3037_v32 = vpop.f32.mrb[86].mxu0  ;;  %v3078_v34 = vpop.f32.mrb[86].mxu1  ;;  %v5568_v22 = vld [vmem:[#allocation4 + $0x208] ss:$16 sps:$4 sm:$0xff]  }
 0x511   :  { %v3038_v17 = vpop.f32.mrb[87].mxu0  ;;  %v3079_v19 = vpop.f32.mrb[87].mxu1  ;;  %v5571_v34 = vld [vmem:[#allocation4 + $0x220] ss:$16 sps:$4 sm:$0xff]  }
 0x512   :  { %v5574_v17 = vld [vmem:[#allocation4 + $0x228] ss:$16 sps:$4 sm:$0xff]   ;;  %v5579_v19 = vld [vmem:[#allocation4 + $0x244] ss:$16 sps:$4 sm:$0xff]  }
 0x516   :  { %v3172_v26 = vpop.f32.mrb[88].mxu0  ;;  %v3213_v27 = vpop.f32.mrb[88].mxu1 }
 0x517   :  { %v3220_v28 = vadd.f32 %v3172_v26, %v2663_v38  ;;  %v3222_v29 = vadd.f32 %v3213_v27, %v2665_v46  ;;  %v3174_v35 = vpop.f32.mrb[89].mxu0  ;;  %v3215_v36 = vpop.f32.mrb[89].mxu1  ;;  %v3379_v38 = vsub.s32 0, %v6200_v44  ;;  %v3387_v46 = vsub.s32 2, %v6200_v44  ;;  %v5582_v26 = vld [vmem:[#allocation4 + $0x24c] ss:$16 sps:$4 sm:$0xff]  }
 0x518   :  { %v3221_v40 = vadd.f32 %v3174_v35, %v2664_v58  ;;  %v3223_v48 = vadd.f32 %v3215_v36, %v2666_v8  ;;  %v3176_v41 = vpop.f32.mrb[90].mxu0  ;;  %v3217_v30 = vpop.f32.mrb[90].mxu1  ;;  %v5577_v27 = vld [vmem:[#allocation4 + $0x240] ss:$16 sps:$4 sm:$0xff]   ;;  %v5588_v35 = vld [vmem:[#allocation4 + $0x26c] ss:$16 sps:$4 sm:$0xff]  }
 0x519   :  { %v3177_v31 = vpop.f32.mrb[91].mxu0  ;;  %v3218_v43 = vpop.f32.mrb[91].mxu1  ;;  %v5583_v36 = vld [vmem:[#allocation4 + $0x260] ss:$16 sps:$4 sm:$0xff]   ;;  %v5592_v30 = vld [vmem:[#allocation4 + $0x288] ss:$16 sps:$4 sm:$0xff]  }
 0x51a   :  { %v5589_v41 = vld [vmem:[#allocation4 + $0x280] ss:$16 sps:$4 sm:$0xff]   ;;  %v5597_v31 = vld [vmem:[#allocation4 + $0x2a4] ss:$16 sps:$4 sm:$0xff]   ;;  %v5600_v43 = vld [vmem:[#allocation4 + $0x2ac] ss:$16 sps:$4 sm:$0xff]  }
 0x51e   :  { %v3311_v45 = vpop.f32.mrb[92].mxu0  ;;  %v3352_v37 = vpop.f32.mrb[92].mxu1 }
 0x51f   :  { %v3359_v49 = vadd.f32 %v3311_v45, %v2801_v9  ;;  %v3361_v42 = vadd.f32 %v3352_v37, %v2803_v59  ;;  %v3313_v4 = vpop.f32.mrb[93].mxu0  ;;  %v3354_v52 = vpop.f32.mrb[93].mxu1  ;;  %v5595_v45 = vld [vmem:[#allocation4 + $0x2a0] ss:$16 sps:$4 sm:$0xff]   ;;  %v5598_v37 = vld [vmem:[#allocation4 + $0x2a8] ss:$16 sps:$4 sm:$0xff]  }
 0x520   :  { %v3360_v60 = vadd.f32 %v3313_v4, %v2802_v2  ;;  %v3362_v12 = vadd.f32 %v3354_v52, %v2804_v33  ;;  %v3315_v58 = vpop.f32.mrb[94].mxu0  ;;  %v3356_v8 = vpop.f32.mrb[94].mxu1  ;;  %v3380_v2 = vrot.slane %v3375_v53, %v3379_v38  ;;  %v3388_v33 = vrot.slane %v3375_v53, %v3387_v46  ;;  %v5601_v4 = vld [vmem:[#allocation4 + $0x2c0] ss:$16 sps:$4 sm:$0xff]   ;;  %v5604_v52 = vld [vmem:[#allocation4 + $0x2c8] ss:$16 sps:$4 sm:$0xff]  }
 0x521   :  { %v3363_v13 = vadd.f32 %v3359_v49, %v2941_v47  ;;  %v3365_v9 = vadd.f32 %v3361_v42, %v2943_v50  ;;  %v3316_v59 = vpop.f32.mrb[95].mxu0  ;;  %v3357_v62 = vpop.f32.mrb[95].mxu1  ;;  %v3392_v47 = vrot.slane %v3375_v53, %v3391_v61  ;;  %v5603_v49 = vld [vmem:[#allocation4 + $0x2c4] ss:$16 sps:$4 sm:$0xff]   ;;  %v5606_v42 = vld [vmem:[#allocation4 + $0x2cc] ss:$16 sps:$4 sm:$0xff]  }
 0x522   :  { %v3364_v63 = vadd.f32 %v3360_v60, %v2942_v10  ;;  %v3366_v3 = vadd.f32 %v3362_v12, %v2944_v11  ;;  %v5609_v60 = vld [vmem:[#allocation4 + $0x2e4] ss:$16 sps:$4 sm:$0xff]   ;;  %v5612_v12 = vld [vmem:[#allocation4 + $0x2ec] ss:$16 sps:$4 sm:$0xff]   ;;  %v5607_v58 = vld [vmem:[#allocation4 + $0x2e0] ss:$16 sps:$4 sm:$0xff]  }
 0x523   :  { %v3367_v51 = vadd.f32 %v3363_v13, %v3081_v18  ;;  %v3369_v0 = vadd.f32 %v3365_v9, %v3083_v16  ;;  %v5565_v16 = vld [vmem:[#allocation4 + $0x200] ss:$16 sps:$4 sm:$0xff]   ;;  %v5610_v8 = vld [vmem:[#allocation4 + $0x2e8] ss:$16 sps:$4 sm:$0xff]   ;;  %v5615_v53 = vld [vmem:[#allocation4 + $0x304] ss:$16 sps:$4 sm:$0xff]  }
 0x524   :  { %v3368_v1 = vadd.f32 %v3364_v63, %v3082_v24  ;;  %v3370_v5 = vadd.f32 %v3366_v3, %v3084_v25  ;;  %v5573_v24 = vld [vmem:[#allocation4 + $0x224] ss:$16 sps:$4 sm:$0xff]   ;;  %v5576_v25 = vld [vmem:[#allocation4 + $0x22c] ss:$16 sps:$4 sm:$0xff]   ;;  %v5613_v9 = vld [vmem:[#allocation4 + $0x300] ss:$16 sps:$4 sm:$0xff]  }
 0x525   :  { %v3371_v50 = vadd.f32 %v3367_v51, %v3220_v28  ;;  %v3373_v6 = vadd.f32 %v3369_v0, %v3222_v29  ;;  %v5580_v28 = vld [vmem:[#allocation4 + $0x248] ss:$16 sps:$4 sm:$0xff]   ;;  %v5585_v29 = vld [vmem:[#allocation4 + $0x264] ss:$16 sps:$4 sm:$0xff]   ;;  %v5618_v13 = vld [vmem:[#allocation4 + $0x30c] ss:$16 sps:$4 sm:$0xff]  }
 0x526   :  { %v3372_v55 = vadd.f32 %v3368_v1, %v3221_v40  ;;  %v3374_v10 = vadd.f32 %v3370_v5, %v3223_v48  ;;  %v5591_v40 = vld [vmem:[#allocation4 + $0x284] ss:$16 sps:$4 sm:$0xff]   ;;  %v5594_v48 = vld [vmem:[#allocation4 + $0x28c] ss:$16 sps:$4 sm:$0xff]   ;;  %v5616_v59 = vld [vmem:[#allocation4 + $0x308] ss:$16 sps:$4 sm:$0xff]  }
 0x527   :  { %v3397_v11 = vadd.f32 %v3380_v2, %v3371_v50  ;;  %v6217_v20 = vadd.f32 %v3388_v33, %v3373_v6  ;;  %v5621_v62 = vld [vmem:[#allocation4 + $0x324] ss:$16 sps:$4 sm:$0xff]   ;;  %v5624_v63 = vld [vmem:[#allocation4 + $0x32c] ss:$16 sps:$4 sm:$0xff]   ;;  %v5619_v3 = vld [vmem:[#allocation4 + $0x320] ss:$16 sps:$4 sm:$0xff]  }
 0x528   :  { %v3398_v21 = vadd.f32 %v3384_v54, %v3372_v55  ;;  %v3400_v7 = vadd.f32 %v3392_v47, %v3374_v10  ;;  %v5622_v51 = vld [vmem:[#allocation4 + $0x328] ss:$16 sps:$4 sm:$0xff]   ;;  %v5627_v0 = vld [vmem:[#allocation4 + $0x344] ss:$16 sps:$4 sm:$0xff]   ;;  %v5630_v2 = vld [vmem:[#allocation4 + $0x34c] ss:$16 sps:$4 sm:$0xff]  }
 0x529   :  { %v3401_v56 = vmax.f32 %v3397_v11, 0.0  ;;  %v5625_v33 = vld [vmem:[#allocation4 + $0x340] ss:$16 sps:$4 sm:$0xff]   ;;  %v5628_v1 = vld [vmem:[#allocation4 + $0x348] ss:$16 sps:$4 sm:$0xff]  }
 0x52a   :  { %v3402_v14 = vmax.f32 %v3398_v21, 0.0  ;;  %v3404_v15 = vmax.f32 %v3400_v7, 0.0  ;;  %v5633_v5 = vld [vmem:[#allocation4 + $0x364] ss:$16 sps:$4 sm:$0xff]   ;;  %v5636_v54 = vld [vmem:[#allocation4 + $0x36c] ss:$16 sps:$4 sm:$0xff]  }
 0x52b   :  { %v3405_v23 = vpack.c.bf16 %v3401_v56, %v3401_v56  ;;  %v5631_v47 = vld [vmem:[#allocation4 + $0x360] ss:$16 sps:$4 sm:$0xff]   ;;  %v5634_v50 = vld [vmem:[#allocation4 + $0x368] ss:$16 sps:$4 sm:$0xff]   ;;  %v5639_v6 = vld [vmem:[#allocation4 + $0x384] ss:$16 sps:$4 sm:$0xff]  }
 0x52c   :  { %v3406_v18 = vpack.c.bf16 %v3402_v14, %v3402_v14  ;;  %v3408_v32 = vpack.c.bf16 %v3404_v15, %v3404_v15  ;;  %v5642_v55 = vld [vmem:[#allocation4 + $0x38c] ss:$16 sps:$4 sm:$0xff]   ;;  %v5637_v10 = vld [vmem:[#allocation4 + $0x380] ss:$16 sps:$4 sm:$0xff]   ;;  %v5640_v11 = vld [vmem:[#allocation4 + $0x388] ss:$16 sps:$4 sm:$0xff]  }
 0x52d   :  { %v5645_v21 = vld [vmem:[#allocation4 + $0x3a4] ss:$16 sps:$4 sm:$0xff]   ;;  %v5648_v7 = vld [vmem:[#allocation4 + $0x3ac] ss:$16 sps:$4 sm:$0xff]   ;;  %v5643_v56 = vld [vmem:[#allocation4 + $0x3a0] ss:$16 sps:$4 sm:$0xff]  }
 0x52e   :  { %4231 = vmatprep.mubr.bf16.mxu0 %v3406_v18  ;;  %4313 = vmatprep.mubr.bf16.mxu1 %v3406_v18  ;;  %v5646_v14 = vld [vmem:[#allocation4 + $0x3a8] ss:$16 sps:$4 sm:$0xff]   ;;  %v5651_v15 = vld [vmem:[#allocation4 + $0x3c4] ss:$16 sps:$4 sm:$0xff]   ;;  %v5654_v18 = vld [vmem:[#allocation4 + $0x3cc] ss:$16 sps:$4 sm:$0xff]  }
 0x52f   :  { %4232 = vmatmul.mubr.bf16.vlgmr.msra.gmra.mrb[96].mxu0 %v3405_v23  ;;  %4314 = vmatmul.mubr.bf16.vlgmr.msra.gmra.mrb[96].mxu1 %v3405_v23  ;;  %v5657_v23 = vld [vmem:[#allocation4 + $0x3e4] ss:$16 sps:$4 sm:$0xff]  }
 0x530   :  { %4241 = vmatpush1.bf16.msra.mxu0 %v5565_v16  ;;  %4323 = vmatpush1.bf16.msra.mxu1 %v5568_v22  ;;  %v5649_v16 = vld [vmem:[#allocation4 + $0x3c0] ss:$16 sps:$4 sm:$0xff]   ;;  %v5652_v22 = vld [vmem:[#allocation4 + $0x3c8] ss:$16 sps:$4 sm:$0xff]  }
 0x531   :  { %4272 = vmatprep.mubr.bf16.mxu0 %v3408_v32  ;;  %4354 = vmatprep.mubr.bf16.mxu1 %v3408_v32  ;;  %v5658_v32 = vld [vmem:[#allocation4 + $0x3e8] ss:$16 sps:$4 sm:$0xff]  }
 0x532   :  { %4242 = vmatprep.subr.bf16.mxu0 %v5573_v24  ;;  %4324 = vmatprep.subr.bf16.mxu1 %v5576_v25  ;;  %v5660_v24 = vld [vmem:[#allocation4 + $0x3ec] ss:$16 sps:$4 sm:$0xff]   ;;  %v5655_v25 = vld [vmem:[#allocation4 + $0x3e0] ss:$16 sps:$4 sm:$0xff]  }
 0x534   :  { %4243 = vmatpush1.bf16.msra.mxu0 %v5571_v34  ;;  %4325 = vmatpush1.bf16.msra.mxu1 %v5574_v17  ;;  %v3403_v34 = vmax.f32 %v6217_v20, 0.0  ;;  %v5661_v17 = vld [vmem:[#allocation6 + $0x40] sm:$0xff]   ;;  %v5669_v20 = vld [vmem:[#allocation6 + $0x50] sm:$0xff]  }
 0x535   :  { %4244 = vmatprep.subr.bf16.mxu0 %v5579_v19  ;;  %4326 = vmatprep.subr.bf16.mxu1 %v5582_v26  ;;  %v5662_v19 = vld [vmem:[#allocation6 + $0xc0] sm:$0xff]  }
 0x536   :  { %v5663_v26 = vld [vmem:[#allocation6] sm:$0xff]  }
 0x538   :  { %4245 = vmatpush1.bf16.msra.mxu0 %v5577_v27  ;;  %4327 = vmatpush1.bf16.msra.mxu1 %v5580_v28  ;;  %v5664_v27 = vld [vmem:[#allocation6 + $0x80] sm:$0xff]   ;;  %v3407_v28 = vpack.c.bf16 %v3403_v34, %v3403_v34 }
 0x539   :  { %4246 = vmatprep.subr.bf16.mxu0 %v5585_v29  ;;  %4328 = vmatprep.subr.bf16.mxu1 %v5588_v35  ;;  %v5665_v29 = vld [vmem:[#allocation6 + $0x48] sm:$0xff]  }
 0x53a   :  { %v5666_v35 = vld [vmem:[#allocation6 + $0xc8] sm:$0xff]  }
 0x53c   :  { %4247 = vmatpush1.bf16.msra.mxu0 %v5583_v36  ;;  %4329 = vmatpush1.bf16.msra.mxu1 %v5586_v39  ;;  %v5667_v36 = vld [vmem:[#allocation6 + $0x8] sm:$0xff]  }
 0x53d   :  { %4248 = vmatprep.subr.bf16.mxu0 %v5591_v40  ;;  %4330 = vmatprep.subr.bf16.mxu1 %v5594_v48  ;;  %v5668_v39 = vld [vmem:[#allocation6 + $0x88] sm:$0xff]   ;;  %v5670_v40 = vld [vmem:[#allocation6 + $0xd0] sm:$0xff]  }
 0x53e   :  { %v5671_v48 = vld [vmem:[#allocation6 + $0x10] sm:$0xff]  }
 0x540   :  { %4249 = vmatpush1.bf16.msra.mxu0 %v5589_v41  ;;  %4331 = vmatpush1.bf16.msra.mxu1 %v5592_v30  ;;  %v5672_v41 = vld [vmem:[#allocation6 + $0x90] sm:$0xff]   ;;  %v5673_v30 = vld [vmem:[#allocation6 + $0x58] sm:$0xff]  }
 0x541   :  { %4250 = vmatprep.subr.bf16.mxu0 %v5597_v31  ;;  %4332 = vmatprep.subr.bf16.mxu1 %v5600_v43  ;;  %v5674_v31 = vld [vmem:[#allocation6 + $0xd8] sm:$0xff]  }
 0x542   :  { %v5675_v43 = vld [vmem:[#allocation6 + $0x18] sm:$0xff]  }
 0x544   :  { %4251 = vmatpush1.bf16.msra.mxu0 %v5595_v45  ;;  %4333 = vmatpush1.bf16.msra.mxu1 %v5598_v37  ;;  %v5676_v45 = vld [vmem:[#allocation6 + $0x98] sm:$0xff]   ;;  %v5677_v37 = vld [vmem:[#allocation6 + $0x60] sm:$0xff]  }
 0x545   :  { %4252 = vmatprep.subr.bf16.mxu0 %v5603_v49  ;;  %4334 = vmatprep.subr.bf16.mxu1 %v5606_v42  ;;  %v5678_v49 = vld [vmem:[#allocation6 + $0xe0] sm:$0xff]  }
 0x546   :  { %v5679_v42 = vld [vmem:[#allocation6 + $0x20] sm:$0xff]  }
 0x548   :  { %4253 = vmatpush1.bf16.msra.mxu0 %v5601_v4  ;;  %4335 = vmatpush1.bf16.msra.mxu1 %v5604_v52  ;;  %v5680_v4 = vld [vmem:[#allocation6 + $0xa0] sm:$0xff]   ;;  %v5681_v52 = vld [vmem:[#allocation6 + $0x68] sm:$0xff]  }
 0x549   :  { %4254 = vmatprep.subr.bf16.mxu0 %v5609_v60  ;;  %4336 = vmatprep.subr.bf16.mxu1 %v5612_v12  ;;  %v5682_v60 = vld [vmem:[#allocation6 + $0xe8] sm:$0xff]  }
 0x54a   :  { %v5683_v12 = vld [vmem:[#allocation6 + $0x28] sm:$0xff]  }
 0x54c   :  { %4255 = vmatpush1.bf16.msra.mxu0 %v5607_v58  ;;  %4337 = vmatpush1.bf16.msra.mxu1 %v5610_v8  ;;  %v5684_v58 = vld [vmem:[#allocation6 + $0xa8] sm:$0xff]   ;;  %v5685_v8 = vld [vmem:[#allocation6 + $0x70] sm:$0xff]  }
 0x54d   :  { %4256 = vmatprep.subr.bf16.mxu0 %v5615_v53  ;;  %4338 = vmatprep.subr.bf16.mxu1 %v5618_v13  ;;  %v5686_v53 = vld [vmem:[#allocation6 + $0xf0] sm:$0xff]  }
 0x54e   :  { %v5687_v13 = vld [vmem:[#allocation6 + $0x30] sm:$0xff]  }
 0x550   :  { %4257 = vmatpush1.bf16.msra.mxu0 %v5613_v9  ;;  %4339 = vmatpush1.bf16.msra.mxu1 %v5616_v59  ;;  %v5688_v9 = vld [vmem:[#allocation6 + $0xb0] sm:$0xff]   ;;  %v5689_v59 = vld [vmem:[#allocation6 + $0x78] sm:$0xff]  }
 0x551   :  { %4258 = vmatprep.subr.bf16.mxu0 %v5621_v62  ;;  %4340 = vmatprep.subr.bf16.mxu1 %v5624_v63  ;;  %v5690_v62 = vld [vmem:[#allocation6 + $0xf8] sm:$0xff]  }
 0x552   :  { %v5691_v63 = vld [vmem:[#allocation6 + $0x38] sm:$0xff]  }
 0x554   :  { %4259 = vmatpush1.bf16.msra.mxu0 %v5619_v3  ;;  %4341 = vmatpush1.bf16.msra.mxu1 %v5622_v51  ;;  %v5692_v3 = vld [vmem:[#allocation6 + $0xb8] sm:$0xff]   ;;  %v3537_v51 = vld [vmem:[%s6246_s9] sm:$0xf] }
 0x555   :  { %4260 = vmatprep.subr.bf16.mxu0 %v5627_v0  ;;  %4342 = vmatprep.subr.bf16.mxu1 %v5630_v2  ;;  %v4182_v0 = vrot.slane %v3537_v51, %v3379_v38  ;;  %v4190_v2 = vrot.slane %v3537_v51, %v3387_v46 }
 0x558   :  { %4261 = vmatpush1.bf16.msra.mxu0 %v5625_v33  ;;  %4343 = vmatpush1.bf16.msra.mxu1 %v5628_v1  ;;  %v4186_v33 = vrot.slane %v3537_v51, %v3383_v57  ;;  %v4194_v1 = vrot.slane %v3537_v51, %v3391_v61 }
 0x559   :  { %4262 = vmatprep.subr.bf16.mxu0 %v5633_v5  ;;  %4344 = vmatprep.subr.bf16.mxu1 %v5636_v54 }
 0x55c   :  { %4263 = vmatpush1.bf16.msra.mxu0 %v5631_v47  ;;  %4345 = vmatpush1.bf16.msra.mxu1 %v5634_v50 }
 0x55d   :  { %4264 = vmatprep.subr.bf16.mxu0 %v5639_v6  ;;  %4346 = vmatprep.subr.bf16.mxu1 %v5642_v55 }
 0x560   :  { %4265 = vmatpush1.bf16.msra.mxu0 %v5637_v10  ;;  %4347 = vmatpush1.bf16.msra.mxu1 %v5640_v11 }
 0x561   :  { %4266 = vmatprep.subr.bf16.mxu0 %v5645_v21  ;;  %4348 = vmatprep.subr.bf16.mxu1 %v5648_v7 }
 0x564   :  { %4267 = vmatpush1.bf16.msra.mxu0 %v5643_v56  ;;  %4349 = vmatpush1.bf16.msra.mxu1 %v5646_v14 }
 0x565   :  { %4268 = vmatprep.subr.bf16.mxu0 %v5651_v15  ;;  %4350 = vmatprep.subr.bf16.mxu1 %v5654_v18 }
 0x568   :  { %4269 = vmatpush1.bf16.msra.mxu0 %v5649_v16  ;;  %4351 = vmatpush1.bf16.msra.mxu1 %v5652_v22 }
 0x569   :  { %4270 = vmatprep.subr.bf16.mxu0 %v5657_v23  ;;  %4352 = vmatprep.subr.bf16.mxu1 %v5660_v24  ;;  %v4435_v24 = vld [vmem:[%s6248_s11] sm:$0x1] }
 0x56c   :  { %4271 = vmatpush1.bf16.msra.mxu0 %v5655_v25  ;;  %4353 = vmatpush1.bf16.msra.mxu1 %v5658_v32 }
 0x56d   :  { %5126 = vmatprep.subr.bf16.mxu0 %v5661_v17  ;;  %5148 = vmatprep.subr.bf16.mxu1 %v5662_v19 }
 0x56f   :  { %4273 = vmatmul.mubr.bf16.vlgmr.msra.gmra.mrb[96].mxu0 %v3407_v28  ;;  %4355 = vmatmul.mubr.bf16.vlgmr.msra.gmra.mrb[96].mxu1 %v3407_v28 }
 0x570   :  { %5127 = vmatpush3.bf16.msra.mxu0 %v5663_v26  ;;  %5149 = vmatpush3.bf16.msra.mxu1 %v5664_v27 }
 0x571   :  { %5128 = vmatprep.subr.bf16.mxu0 %v5665_v29  ;;  %5150 = vmatprep.subr.bf16.mxu1 %v5666_v35 }
 0x574   :  { %5129 = vmatpush3.bf16.msra.mxu0 %v5667_v36  ;;  %5151 = vmatpush3.bf16.msra.mxu1 %v5668_v39 }
 0x575   :  { %5130 = vmatprep.subr.bf16.mxu0 %v5669_v20  ;;  %5152 = vmatprep.subr.bf16.mxu1 %v5670_v40 }
 0x578   :  { %5131 = vmatpush3.bf16.msra.mxu0 %v5671_v48  ;;  %5153 = vmatpush3.bf16.msra.mxu1 %v5672_v41 }
 0x579   :  { %5132 = vmatprep.subr.bf16.mxu0 %v5673_v30  ;;  %5154 = vmatprep.subr.bf16.mxu1 %v5674_v31 }
 0x57c   :  { %5133 = vmatpush3.bf16.msra.mxu0 %v5675_v43  ;;  %5155 = vmatpush3.bf16.msra.mxu1 %v5676_v45 }
 0x57d   :  { %5134 = vmatprep.subr.bf16.mxu0 %v5677_v37  ;;  %5156 = vmatprep.subr.bf16.mxu1 %v5678_v49 }
 0x580   :  { %5135 = vmatpush3.bf16.msra.mxu0 %v5679_v42  ;;  %5157 = vmatpush3.bf16.msra.mxu1 %v5680_v4 }
 0x581   :  { %5136 = vmatprep.subr.bf16.mxu0 %v5681_v52  ;;  %5158 = vmatprep.subr.bf16.mxu1 %v5682_v60 }
 0x584   :  { %5137 = vmatpush3.bf16.msra.mxu0 %v5683_v12  ;;  %5159 = vmatpush3.bf16.msra.mxu1 %v5684_v58 }
 0x585   :  { %5138 = vmatprep.subr.bf16.mxu0 %v5685_v8  ;;  %5160 = vmatprep.subr.bf16.mxu1 %v5686_v53 }
 0x588   :  { %5139 = vmatpush3.bf16.msra.mxu0 %v5687_v13  ;;  %5161 = vmatpush3.bf16.msra.mxu1 %v5688_v9 }
 0x589   :  { %5140 = vmatprep.subr.bf16.mxu0 %v5689_v59  ;;  %5162 = vmatprep.subr.bf16.mxu1 %v5690_v62 }
 0x58c   :  { %5141 = vmatpush3.bf16.msra.mxu0 %v5691_v63  ;;  %5163 = vmatpush3.bf16.msra.mxu1 %v5692_v3 }
 0x642   :  { %v4274_v5 = vpop.f32.mrb[96].mxu0  ;;  %v4356_v54 = vpop.f32.mrb[96].mxu1 }
 0x643   :  { %v5235_v47 = vadd.f32 %v4274_v5, %v4182_v0  ;;  %v5237_v50 = vadd.f32 %v4356_v54, %v4190_v2  ;;  %v4276_v6 = vpop.f32.mrb[97].mxu0  ;;  %v4358_v55 = vpop.f32.mrb[97].mxu1 }
 0x644   :  { %v5236_v10 = vadd.f32 %v4276_v6, %v4186_v33  ;;  %v5238_v11 = vadd.f32 %v4358_v55, %v4194_v1  ;;  %v4278_v21 = vpop.f32.mrb[98].mxu0  ;;  %v4360_v7 = vpop.f32.mrb[98].mxu1 }
 0x645   :  { %v4363_v38 = vmax.f32 %v5235_v47, 0.0  ;;  %v4365_v56 = vmax.f32 %v5237_v50, 0.0  ;;  %v4279_v14 = vpop.f32.mrb[99].mxu0  ;;  %v4361_v46 = vpop.f32.mrb[99].mxu1 }
 0x646   :  { %v4364_v15 = vmax.f32 %v5236_v10, 0.0  ;;  %v4366_v18 = vmax.f32 %v5238_v11, 0.0 }
 0x647   :  { %v4367_v44 = vpack.c.bf16 %v4363_v38, %v4363_v38  ;;  %v4369_v61 = vpack.c.bf16 %v4365_v56, %v4365_v56 }
 0x648   :  { %v4368_v57 = vpack.c.bf16 %v4364_v15, %v4364_v15  ;;  %v4370_v16 = vpack.c.bf16 %v4366_v18, %v4366_v18 }
 0x64a   :  { %4660 = vmatprep.mubr.bf16.mxu0 %v4368_v57  ;;  %4700 = vmatprep.mubr.bf16.mxu1 %v4370_v16 }
 0x64b   :  { %4661 = vmatmul.mubr.bf16.vlgmr.msra.gmra.mrb[100].mxu0 %v4367_v44  ;;  %4701 = vmatmul.mubr.bf16.vlgmr.msra.gmra.mrb[100].mxu1 %v4369_v61 }
 0x71e   :  { %v5142_v22 = vpop.f32.mrb[100].mxu0  ;;  %v5164_v23 = vpop.f32.mrb[100].mxu1 }
 0x71f   :  { %v5143_v25 = vpop.f32.mrb[101].mxu0  ;;  %v5165_v32 = vpop.f32.mrb[101].mxu1 }
 0x720   :  { %v5144_v34 = vadd.f32 %v5143_v25, %v5142_v22  ;;  %v5166_v17 = vadd.f32 %v5165_v32, %v5164_v23  ;;  %v5145_v19 = vpop.f32.mrb[102].mxu0  ;;  %v5167_v26 = vpop.f32.mrb[102].mxu1 }
 0x721   :  { %v5146_v27 = vpop.f32.mrb[103].mxu0  ;;  %v5168_v28 = vpop.f32.mrb[103].mxu1 }
 0x722   :  { %v4663_v29 = vadd.f32 %v5144_v34, %v4435_v24 }
 0x724   :  { %v4703_v35 = vadd.f32 %v5166_v17, %v4663_v29 }
 0x726   :  { %v4708_v36 = vmax.f32 %v4703_v35, 0.0 }
 0x728   :  { %4709 = vst [vmem:[%s6249_s12] sm:$0x1] %v4708_v36 }
 0x729   :  { %4714 = vsyncpa [#allocation3], 1 }
 0x72a   :  { %4715 = vsyncpa [#allocation5], 1 }

</bundles_post_ra>
